<compile_context>
chip_gen: v6e
topology: v6e:2x2x1
jax: 0.10.0
libtpu: 0.0.40
codegen_flags: <defaults>
</compile_context>

<pallas_src>
import functools

import jax
import jax.numpy as jnp
from jax.experimental import pallas as pl
from jax.experimental.pallas import tpu as pltpu

FEATURE_DIM = 1024      # I3D pre-logits feature width
N_CLASSES = 10          # config.n_classes (synthetic)
PATCH = (2, 4, 4)       # (pt, ph, pw) non-overlapping 3D patches
LANE = 128


def _round_up(x, m):
    return (x + m - 1) // m * m


def _depth_classifier_kernel(x_ref, w_enc_ref, b_enc_ref, w_cls_ref, b_cls_ref,
                             out_ref, acc_ref, *, inv_p, p_total, tile_p, mask_tail):
    """Fused: patch projection -> ReLU -> global avg pool (accumulated) -> classifier."""
    j = pl.program_id(1)                             # P-reduction axis (last, "arbitrary")

    @pl.when(j == 0)
    def _():
        acc_ref[...] = jnp.zeros_like(acc_ref)

    x = x_ref[...]                                   # (tile_b, tile_p, K=32) bf16
    tb, tp, k = x.shape
    # Single flattened (tile_b*tile_p, K) @ (K, F) MXU matmul, f32 accumulation.
    # K=32 under-fills the MXU, but the kernel is HBM-bound so that is irrelevant.
    h = jnp.dot(x.reshape(tb * tp, k), w_enc_ref[...],
                preferred_element_type=jnp.float32)  # (tile_b*tile_p, F) f32
    h = jnp.maximum(h + b_enc_ref[...], 0.0)         # bias + ReLU in f32 (VPU has slack)
    h = h.reshape(tb, tp, -1)

    if mask_tail:
        # Last P tile may extend past P; zero the invalid patch rows before accumulating.
        rows_valid = p_total - j * tile_p
        patch_idx = jax.lax.broadcasted_iota(jnp.int32, (1, tp, 1), 1)
        h = jnp.where(patch_idx < rows_valid, h, 0.0)

    # Per-batch partial sum over this P tile (XLU reduce), accumulate in f32.
    acc_ref[...] += h.sum(axis=1)

    @pl.when(j == pl.num_programs(1) - 1)
    def _():
        feat = (acc_ref[...] * inv_p).astype(jnp.bfloat16)   # global avg pool, static 1/P
        logits = jnp.dot(feat, w_cls_ref[...],
                         preferred_element_type=jnp.float32) + b_cls_ref[...]
        out_ref[...] = logits.astype(out_ref.dtype)          # lane-dense (tile_b, 128) store


def init_params(key, k_dim, feature_dim=FEATURE_DIM, n_classes=N_CLASSES):
    k1, k2, k3, k4 = jax.random.split(key, 4)
    # Encoder patch-projection weights (stand-in for the I3D backbone).
    w_enc = jax.random.normal(k1, (k_dim, feature_dim), jnp.float32) * (1.0 / jnp.sqrt(k_dim))
    b_enc = jax.random.normal(k2, (1, feature_dim), jnp.float32) * 0.01
    # Classifier = nn.Linear(1024, n_classes): weight (n_classes, 1024), bias (n_classes,)
    w_cls = jax.random.normal(k3, (n_classes, feature_dim), jnp.float32) * (1.0 / jnp.sqrt(feature_dim))
    b_cls = jax.random.normal(k4, (n_classes,), jnp.float32) * 0.01
    return w_enc, b_enc, w_cls, b_cls


def _patchify(depth, patch=PATCH):
    """(B, C, T, H, W) NCDHW -> (B, P, K) channels-last patch layout."""
    B, C, T, H, W = depth.shape
    pt, ph, pw = patch
    x = depth.reshape(B, C, T // pt, pt, H // ph, ph, W // pw, pw)
    x = x.transpose(0, 2, 4, 6, 1, 3, 5, 7)          # (B, T/pt, H/ph, W/pw, C, pt, ph, pw)
    P = (T // pt) * (H // ph) * (W // pw)
    K = C * pt * ph * pw
    return x.reshape(B, P, K), P, K


def depth_classifier_forward(depth, params, *, tile_p=2048, tile_b=None):
    w_enc, b_enc, w_cls, b_cls = params
    x, P, K = _patchify(depth)
    B = x.shape[0]
    F = w_enc.shape[1]
    n_classes = w_cls.shape[0]

    # Native K (no 128-lane padding of the streamed activation): the bf16 cast fuses with
    # the patchify transpose into one producer pass; the kernel contracts K=32 directly.
    x_bf = x.astype(jnp.bfloat16)                     # (B, P, K) bf16
    w_enc_bf = w_enc.astype(jnp.bfloat16)             # (K, F)   bf16

    # Lane-dense classifier output: pad n_classes -> 128 with zero weight columns / bias;
    # slice back to n_classes in the wrapper.  Classifier weight in bf16 (tiny, one-shot dot).
    Cp = _round_up(n_classes, LANE)
    w_cls_bf = jnp.pad(w_cls.T, ((0, 0), (0, Cp - n_classes))).astype(jnp.bfloat16)  # (F, Cp)
    b_cls_2d = jnp.pad(b_cls.reshape(1, n_classes), ((0, 0), (0, Cp - n_classes)))   # (1, Cp) f32

    # P tile: as large as possible (per-step overhead ~0.35us; bigger DMAs -> better HBM eff).
    tile_p = min(tile_p, P)
    if tile_p < P:
        tile_p = max(8, (tile_p // 8) * 8)            # keep sublane-aligned blocks
    num_p_blocks = pl.cdiv(P, tile_p)
    mask_tail = (P % tile_p) != 0

    # Batch tile: "parallel" grid axis so v7x's two TensorCores split B when it is large.
    if tile_b is None:
        tile_b = 8 if (B % 8 == 0) else B
    tile_b = min(tile_b, B)
    if B % tile_b != 0:
        tile_b = B
    num_b_blocks = B // tile_b

    kernel = functools.partial(_depth_classifier_kernel,
                               inv_p=1.0 / P, p_total=P, tile_p=tile_p,
                               mask_tail=mask_tail)

    out = pl.pallas_call(
        kernel,
        out_shape=jax.ShapeDtypeStruct((B, Cp), jnp.float32),
        grid=(num_b_blocks, num_p_blocks),
        in_specs=[
            pl.BlockSpec((tile_b, tile_p, K), lambda i, j: (i, j, 0)),   # streamed activation
            pl.BlockSpec((K, F), lambda i, j: (0, 0)),                   # encoder weight (resident)
            pl.BlockSpec((1, F), lambda i, j: (0, 0)),                   # encoder bias
            pl.BlockSpec((F, Cp), lambda i, j: (0, 0)),                  # classifier weight
            pl.BlockSpec((1, Cp), lambda i, j: (0, 0)),                  # classifier bias
        ],
        out_specs=pl.BlockSpec((tile_b, Cp), lambda i, j: (i, 0)),
        scratch_shapes=[pltpu.VMEM((tile_b, F), jnp.float32)],           # f32 pool accumulator
        compiler_params=pltpu.CompilerParams(
            # batch axis parallel (megacore on v7x), P-reduction axis must stay arbitrary.
            dimension_semantics=("parallel", "arbitrary"),
            # Explicit VMEM budget with headroom; fits v7x's 64 MiB physical VMEM even at
            # tile_p=2048 (x tile ~1 MiB bf16 x 2 buffers + resident weights < 3 MiB).
            vmem_limit_bytes=32 * 1024 * 1024),
    )(x_bf, w_enc_bf, b_enc, w_cls_bf, b_cls_2d)
    return out[:, :n_classes]


def _reference_forward(depth, params):
    """Pure-JAX reference (same bf16 operand rounding, f32 accumulation)."""
    w_enc, b_enc, w_cls, b_cls = params
    x, _, _ = _patchify(depth)
    xb = x.astype(jnp.bfloat16).astype(jnp.float32)
    wb = w_enc.astype(jnp.bfloat16).astype(jnp.float32)
    h = jnp.maximum(jnp.einsum("bpk,kf->bpf", xb, wb) + b_enc, 0.0)
    feat = jnp.mean(h, axis=1)
    fb = feat.astype(jnp.bfloat16).astype(jnp.float32)
    wcb = w_cls.astype(jnp.bfloat16).astype(jnp.float32)
    return fb @ wcb.T + b_cls


if __name__ == "__main__":
    key = jax.random.PRNGKey(0)
    k_in, k_par = jax.random.split(key)

    # Depth video: batch=2, channels=1 (depth), T=8, H=W=16 (NCDHW, like the PyTorch module)
    depth = jax.random.normal(k_in, (2, 1, 8, 16, 16), jnp.float32)

    k_dim = PATCH[0] * PATCH[1] * PATCH[2] * 1
    params = init_params(k_par, k_dim)

    ref = _reference_forward(depth, params)

    # 1) Default tiling (single P tile at this toy size).
    out = jax.block_until_ready(depth_classifier_forward(depth, params))
    assert out.shape == (2, N_CLASSES), out.shape
    assert jnp.allclose(out, ref, atol=1e-2, rtol=1e-2), "mismatch vs reference (default tile)"

    # 2) Multi-step P reduction: exercises the accumulator / pipelined grid path (P=64, 4 steps).
    out2 = jax.block_until_ready(depth_classifier_forward(depth, params, tile_p=16))
    assert jnp.allclose(out2, ref, atol=1e-2, rtol=1e-2), "mismatch vs reference (tile_p=16)"

    # 3) Non-divisible P tile: exercises the masked tail tile (P=64, tiles of 24 -> tail of 16).
    out3 = jax.block_until_ready(depth_classifier_forward(depth, params, tile_p=24))
    assert jnp.allclose(out3, ref, atol=1e-2, rtol=1e-2), "mismatch vs reference (masked tail)"

    print("KERNEL_OK")
</pallas_src>

<mosaic_0001>
module attributes {stable_mosaic.version = 11 : i64} {
  func.func @_depth_classifier_kernel(%arg0: i32, %arg1: i32, %arg2: memref<2x64x32xbf16, #tpu.memory_space<vmem>>, %arg3: memref<32x1024xbf16, #tpu.memory_space<vmem>>, %arg4: memref<1x1024xf32, #tpu.memory_space<vmem>>, %arg5: memref<1024x128xbf16, #tpu.memory_space<vmem>>, %arg6: memref<1x128xf32, #tpu.memory_space<vmem>>, %arg7: memref<2x128xf32, #tpu.memory_space<vmem>>, %arg8: memref<2x1024xf32, #tpu.memory_space<vmem>>) attributes {dimension_semantics = [#tpu.dimension_semantics<parallel>, #tpu.dimension_semantics<arbitrary>], iteration_bounds = array<i64: 1, 1>, scalar_prefetch = 0 : i64, scratch_operands = 1 : i64, tpu.core_type = #tpu.core_type<tc>, window_params = [{transform_indices = @transform_0, window_bounds = array<i64: 2, 64, 32>}, {pipeline_mode = #tpu.pipeline_mode<synchronous>, transform_indices = @transform_1, window_bounds = array<i64: 32, 1024>}, {pipeline_mode = #tpu.pipeline_mode<synchronous>, transform_indices = @transform_2, window_bounds = array<i64: 1, 1024>}, {pipeline_mode = #tpu.pipeline_mode<synchronous>, transform_indices = @transform_3, window_bounds = array<i64: 1024, 128>}, {pipeline_mode = #tpu.pipeline_mode<synchronous>, transform_indices = @transform_4, window_bounds = array<i64: 1, 128>}, {transform_indices = @transform_5, window_bounds = array<i64: 2, 128>}]} {
    %c0_i32 = arith.constant 0 : i32
    %0 = arith.cmpi eq, %arg1, %c0_i32 : i32
    %1 = arith.extui %0 : i1 to i32
    %c0_i32_0 = arith.constant 0 : i32
    %2 = arith.cmpi ne, %1, %c0_i32_0 : i32
    scf.if %2 {
      %cst_15 = arith.constant 0.000000e+00 : f32
      %20 = vector.broadcast %cst_15 : f32 to vector<2x1024xf32>
      %c0_16 = arith.constant 0 : index
      %c0_17 = arith.constant 0 : index
      %21 = vector.load %arg8[%c0_16, %c0_17] : memref<2x1024xf32, #tpu.memory_space<vmem>>, vector<2x1024xf32>
      tpu.vector_store %arg8[%c0_16, %c0_17], %20 {strides = array<i32>} : memref<2x1024xf32, #tpu.memory_space<vmem>>, vector<2x1024xf32>,
    } else {
    }
    %c0 = arith.constant 0 : index
    %c0_1 = arith.constant 0 : index
    %c0_2 = arith.constant 0 : index
    %3 = vector.load %arg2[%c0, %c0_1, %c0_2] : memref<2x64x32xbf16, #tpu.memory_space<vmem>>, vector<2x64x32xbf16>
    %4 = vector.shape_cast %3 : vector<2x64x32xbf16> to vector<128x32xbf16>
    %c0_3 = arith.constant 0 : index
    %c0_4 = arith.constant 0 : index
    %5 = vector.load %arg3[%c0_3, %c0_4] : memref<32x1024xbf16, #tpu.memory_space<vmem>>, vector<32x1024xbf16>
    %cst = arith.constant dense<0.000000e+00> : vector<128x1024xf32>
    %6 = tpu.matmul %4, %5, %cst {dimension_numbers = #tpu.dot_dimension_numbers<[1], [0], [0], [1], [0, 0, 1, 1], [], []>} : vector<128x32xbf16>, vector<32x1024xbf16>, vector<128x1024xf32> -> vector<128x1024xf32>
    %c0_5 = arith.constant 0 : index
    %c0_6 = arith.constant 0 : index
    %7 = vector.load %arg4[%c0_5, %c0_6] : memref<1x1024xf32, #tpu.memory_space<vmem>>, vector<1x1024xf32>
    %8 = vector.broadcast %7 : vector<1x1024xf32> to vector<128x1024xf32>
    %9 = arith.addf %6, %8 : vector<128x1024xf32>
    %cst_7 = arith.constant 0.000000e+00 : f32
    %10 = vector.broadcast %cst_7 : f32 to vector<128x1024xf32>
    %11 = arith.maximumf %9, %10 : vector<128x1024xf32>
    %12 = vector.shape_cast %11 : vector<128x1024xf32> to vector<2x64x1024xf32>
    %c0_8 = arith.constant 0 : index
    %c0_9 = arith.constant 0 : index
    %13 = vector.load %arg8[%c0_8, %c0_9] : memref<2x1024xf32, #tpu.memory_space<vmem>>, vector<2x1024xf32>
    %cst_10 = arith.constant dense<0.000000e+00> : vector<2x1024xf32>
    %14 = vector.multi_reduction <add>, %12, %cst_10 [1] : vector<2x64x1024xf32> to vector<2x1024xf32>
    %15 = arith.addf %13, %14 : vector<2x1024xf32>
    %c0_11 = arith.constant 0 : index
    %c0_12 = arith.constant 0 : index
    %16 = vector.load %arg8[%c0_11, %c0_12] : memref<2x1024xf32, #tpu.memory_space<vmem>>, vector<2x1024xf32>
    tpu.vector_store %arg8[%c0_11, %c0_12], %15 {strides = array<i32>} : memref<2x1024xf32, #tpu.memory_space<vmem>>, vector<2x1024xf32>,
    %c0_i32_13 = arith.constant 0 : i32
    %17 = arith.cmpi eq, %arg1, %c0_i32_13 : i32
    %18 = arith.extui %17 : i1 to i32
    %c0_i32_14 = arith.constant 0 : i32
    %19 = arith.cmpi ne, %18, %c0_i32_14 : i32
    scf.if %19 {
      %c0_15 = arith.constant 0 : index
      %c0_16 = arith.constant 0 : index
      %20 = vector.load %arg8[%c0_15, %c0_16] : memref<2x1024xf32, #tpu.memory_space<vmem>>, vector<2x1024xf32>
      %cst_17 = arith.constant 1.562500e-02 : f32
      %21 = vector.broadcast %cst_17 : f32 to vector<2x1024xf32>
      %22 = arith.mulf %20, %21 : vector<2x1024xf32>
      %23 = arith.truncf %22 : vector<2x1024xf32> to vector<2x1024xbf16>
      %c0_18 = arith.constant 0 : index
      %c0_19 = arith.constant 0 : index
      %24 = vector.load %arg5[%c0_18, %c0_19] : memref<1024x128xbf16, #tpu.memory_space<vmem>>, vector<1024x128xbf16>
      %cst_20 = arith.constant dense<0.000000e+00> : vector<2x128xf32>
      %25 = tpu.matmul %23, %24, %cst_20 {dimension_numbers = #tpu.dot_dimension_numbers<[1], [0], [0], [1], [0, 0, 1, 1], [], []>} : vector<2x1024xbf16>, vector<1024x128xbf16>, vector<2x128xf32> -> vector<2x128xf32>
      %c0_21 = arith.constant 0 : index
      %c0_22 = arith.constant 0 : index
      %26 = vector.load %arg6[%c0_21, %c0_22] : memref<1x128xf32, #tpu.memory_space<vmem>>, vector<1x128xf32>
      %27 = vector.broadcast %26 : vector<1x128xf32> to vector<2x128xf32>
      %28 = arith.addf %25, %27 : vector<2x128xf32>
      %c0_23 = arith.constant 0 : index
      %c0_24 = arith.constant 0 : index
      %29 = vector.load %arg7[%c0_23, %c0_24] : memref<2x128xf32, #tpu.memory_space<vmem>>, vector<2x128xf32>
      tpu.vector_store %arg7[%c0_23, %c0_24], %28 {strides = array<i32>} : memref<2x128xf32, #tpu.memory_space<vmem>>, vector<2x128xf32>,
    } else {
    }
    return
  }
  func.func @transform_0(%arg0: i32, %arg1: i32) -> (i32, i32, i32) {
    %c0_i32 = arith.constant 0 : i32
    %c0_i32_0 = arith.constant 0 : i32
    return %arg0, %arg1, %c0_i32 : i32, i32, i32
  }
  func.func @transform_1(%arg0: i32, %arg1: i32) -> (i32, i32) {
    %c0_i32 = arith.constant 0 : i32
    %c0_i32_0 = arith.constant 0 : i32
    %c0_i32_1 = arith.constant 0 : i32
    return %c0_i32, %c0_i32_0 : i32, i32
  }
  func.func @transform_2(%arg0: i32, %arg1: i32) -> (i32, i32) {
    %c0_i32 = arith.constant 0 : i32
    %c0_i32_0 = arith.constant 0 : i32
    %c0_i32_1 = arith.constant 0 : i32
    return %c0_i32, %c0_i32_0 : i32, i32
  }
  func.func @transform_3(%arg0: i32, %arg1: i32) -> (i32, i32) {
    %c0_i32 = arith.constant 0 : i32
    %c0_i32_0 = arith.constant 0 : i32
    %c0_i32_1 = arith.constant 0 : i32
    return %c0_i32, %c0_i32_0 : i32, i32
  }
  func.func @transform_4(%arg0: i32, %arg1: i32) -> (i32, i32) {
    %c0_i32 = arith.constant 0 : i32
    %c0_i32_0 = arith.constant 0 : i32
    %c0_i32_1 = arith.constant 0 : i32
    return %c0_i32, %c0_i32_0 : i32, i32
  }
  func.func @transform_5(%arg0: i32, %arg1: i32) -> (i32, i32) {
    %c0_i32 = arith.constant 0 : i32
    %c0_i32_0 = arith.constant 0 : i32
    return %arg0, %c0_i32 : i32, i32
  }
}

</mosaic_0001>

<bundles_post_ra>
// kernel: tpu_custom_call.1
= control target key start
LH: loop header
LB: loop body
LE: loop exit
PB: predicated region body
PF: predicated region fallthrough
CT: control target
= control target key end

     0   :  { %10 = vsyncpa [#allocation4], 0  ;;  %s2670_s0 = inlined_call_operand.vmem [shape: bf16[2,64,32], index: 0, kind: input, shape index: {}]   ;;  %s2671_s1 = inlined_call_operand.hbm [shape: bf16[32,1024], index: 1, kind: input, shape index: {}]   ;;  %s2672_s2 = inlined_call_operand.vmem [shape: f32[1,1024], index: 2, kind: input, shape index: {}]   ;;  %s2673_s3 = inlined_call_operand.hbm [shape: bf16[1024,128], index: 3, kind: input, shape index: {}]   ;;  %s2674_s4 = inlined_call_operand.vmem [shape: f32[1,128], index: 4, kind: input, shape index: {}]   ;;  %s2675_s5 = inlined_call_operand.hbm [shape: f32[2,128], index: 5, kind: output, shape index: {}]  }
   0x1   :  { %11 = vsyncpa [#allocation7], 0 }
   0x2   :  { %12 = vsyncpa [#allocation5], 0  ;;  %s2286_s18 = smov [#allocation3]  }
   0x3   :  { %s20_s19 = sshll.u32 %s2286_s18, 4  ;;  %s21_s19 = int_to_ptr.vmem [resolvable:$true] %s20_s19 }
   0x4   :  { %s2228_s20 = scalar_lea.vmem %s21_s19, 2048  ;;  %p2233_p1 = scmp.lt.s32.totalorder %s21_s19, %s21_s19 }
   0x5   :  { %p2229_p0 = scmp.ne.s32.totalorder %s21_s19, %s2228_s20  ;;  %p2234_p2 = scmp.lt.s32.totalorder %s2228_s20, %s2228_s20 }
   0x7   :  { %p2235_p3 = por %p2234_p2, %p2233_p1 }
   0x9   :  { %p2236_p4 = pnand %p2235_p3, %p2229_p0 }
   0xb   :  { %2239 = shalt.err (!%p2236_p4)
}
   0xc   :  { %s2287_s21 = smov 512   ;;  %s2288_s22 = smov 32  }
   0xd   :  { %26 = dma.hbm_to_vmem [thread:$0]  %s2671_s1, 2048, %s21_s19, [#allocation4], %s2287_s21, %s2287_s21, %s2288_s22  }
   0xe   :  { %s2289_s25 = smov [#allocation6]  }
   0xf   :  { %s34_s26 = sshll.u32 %s2289_s25, 4  ;;  %s35_s26 = int_to_ptr.vmem [resolvable:$true] %s34_s26 }
  0x10   :  { %s2248_s27 = scalar_lea.vmem %s35_s26, 8192  ;;  %p2253_p6 = scmp.lt.s32.totalorder %s35_s26, %s35_s26 }
  0x11   :  { %p2249_p5 = scmp.ne.s32.totalorder %s35_s26, %s2248_s27  ;;  %p2254_p7 = scmp.lt.s32.totalorder %s2248_s27, %s2248_s27 }
  0x13   :  { %p2255_p8 = por %p2254_p7, %p2253_p6 }
  0x15   :  { %p2256_p9 = pnand %p2255_p8, %p2249_p5 }
  0x17   :  { %2259 = shalt.err (!%p2256_p9)
}
  0x18   :  { %s2290_s28 = smov 64   ;;  %s2291_s29 = smov 4  }
  0x19   :  { %40 = dma.hbm_to_vmem [thread:$0]  %s2673_s3, 8192, %s35_s26, [#allocation7], %s2290_s28, %s2290_s28, %s2291_s29  }
  0x1a   :  { %2280 = dma.done.wait [#allocation4], 2048  }
  0x1b   :  { %2281 = vsyncadd [#allocation4], 4294965248 }
  0x1c   :  { %2282 = dma.done.wait [#allocation7], 8192  }
  0x1d   :  { %2283 = vsyncadd [#allocation7], 4294959104  ;;  %v2292_v0 = vmov 0   ;;  %v80_v1 = vld [vmem:[#allocation3 + $0x40] sm:$0xff]  ;;  %v81_v3 = vld [vmem:[#allocation3 + $0x48] sm:$0xff]  ;;  %vm250_vm0 = vcmask 261120  }
  0x1e   :  { %307 = vmatprep.mubr.bf16.mxu0 %v2292_v0  ;;  %420 = vmatprep.mubr.bf16.mxu1 %v2292_v0  ;;  %v84_v2 = vld [vmem:[#allocation3 + $0x60] sm:$0xff]  ;;  %v85_v5 = vld [vmem:[#allocation3 + $0x68] sm:$0xff]  ;;  %v82_v15 = vld [vmem:[#allocation3 + $0x50] sm:$0xff]  ;;  %vm1154_vm1 = vcmask 1041409   ;;  %vm1156_vm2 = vcmask 1043459   ;;  %vm1158_vm3 = vcmask 1045509  }
  0x1f   :  { %v1947_v4 = vcombine.high %v80_v1, %v84_v2  ;;  %v1946_v6 = vcombine.low %v80_v1, %v84_v2  ;;  %v72_v7 = vld [vmem:[#allocation3] sm:$0xff]  ;;  %v1949_v9 = vcombine.high %v81_v3, %v85_v5  ;;  %v1948_v10 = vcombine.low %v81_v3, %v85_v5  ;;  %v73_v12 = vld [vmem:[#allocation3 + $0x8] sm:$0xff]  ;;  %v86_v17 = vld [vmem:[#allocation3 + $0x70] sm:$0xff]  ;;  %s2294_s23 = smov [#allocation8]  }
  0x20   :  { %v76_v8 = vld [vmem:[#allocation3 + $0x20] sm:$0xff]  ;;  %v77_v13 = vld [vmem:[#allocation3 + $0x28] sm:$0xff]  ;;  %v83_v18 = vld [vmem:[#allocation3 + $0x58] sm:$0xff]  ;;  %v1951_v21 = vcombine.high %v82_v15, %v86_v17  ;;  %v1950_v24 = vcombine.low %v82_v15, %v86_v17  ;;  %vm1160_vm4 = vcmask 1047559   ;;  %s1920_s24 = sshll.u32 %s2294_s23, 4  ;;  %s1921_s24 = int_to_ptr.vmem [resolvable:$true] %s1920_s24 }
  0x21   :  { %v1939_v11 = vcombine.high %v72_v7, %v76_v8  ;;  %287 = vmatprep.subr.bf16.mxu0 %v1947_v4  ;;  %v1941_v14 = vcombine.high %v73_v12, %v77_v13  ;;  %400 = vmatprep.subr.bf16.mxu1 %v1949_v9  ;;  %v1938_v16 = vcombine.low %v72_v7, %v76_v8  ;;  %v87_v19 = vld [vmem:[#allocation3 + $0x78] sm:$0xff]  ;;  %v2148_v23 = vld [vmem:[%s2670_s0] sm:$0xff]   ;;  %v74_v26 = vld [vmem:[#allocation3 + $0x10] sm:$0xff]  ;;  %v90_v9 = vlaneseq  ;;  %p2265_p11 = scmp.lt.s32.totalorder %s1921_s24, %s1921_s24 }
  0x22   :  { %288 = vmatpush1.bf16.msra.mxu0 %v1946_v6  ;;  %401 = vmatpush1.bf16.msra.mxu1 %v1948_v10  ;;  %v1940_v20 = vcombine.low %v73_v12, %v77_v13  ;;  %v1953_v22 = vcombine.high %v83_v18, %v87_v19  ;;  %v1952_v25 = vcombine.low %v83_v18, %v87_v19  ;;  %v78_v27 = vld [vmem:[#allocation3 + $0x30] sm:$0xff]  ;;  %v75_v28 = vld [vmem:[#allocation3 + $0x18] sm:$0xff]  ;;  %v2149_v33 = vld [vmem:[%s2670_s0 + $0x8] sm:$0xff]  }
  0x23   :  { %289 = vmatprep.subr.bf16.mxu0 %v1939_v11  ;;  %402 = vmatprep.subr.bf16.mxu1 %v1941_v14  ;;  %v1943_v29 = vcombine.high %v74_v26, %v78_v27  ;;  %v79_v30 = vld [vmem:[#allocation3 + $0x38] sm:$0xff]  ;;  %v1942_v32 = vcombine.low %v74_v26, %v78_v27  ;;  %v2150_v35 = vld [vmem:[%s2670_s0 + $0x10] sm:$0xff]   ;;  %v2152_v37 = vld [vmem:[%s2670_s0 + $0x20] sm:$0xff]   ;;  %v2419_v10 = vshrl.u32 %v90_v9, 7 }
  0x24   :  { %v1945_v31 = vcombine.high %v75_v28, %v79_v30  ;;  %v1944_v34 = vcombine.low %v75_v28, %v79_v30  ;;  %v2151_v36 = vld [vmem:[%s2670_s0 + $0x18] sm:$0xff]   ;;  %v2153_v38 = vld [vmem:[%s2670_s0 + $0x28] sm:$0xff]   ;;  %v2154_v39 = vld [vmem:[%s2670_s0 + $0x30] sm:$0xff]  }
  0x25   :  { %v2155_v40 = vld [vmem:[%s2670_s0 + $0x38] sm:$0xff]   ;;  %v2160_v45 = vld [vmem:[#allocation6 + $0x70] sm:$0xff]   ;;  %v2164_v49 = vld [vmem:[#allocation6 + $0x68] sm:$0xff]   ;;  %v92_v14 = vsub.s32 0, %v2419_v10  ;;  %v100_v17 = vsub.s32 2, %v2419_v10  ;;  %v96_v19 = vsub.s32 1, %v2419_v10 }
  0x26   :  { %290 = vmatpush1.bf16.msra.mxu0 %v1938_v16  ;;  %403 = vmatpush1.bf16.msra.mxu1 %v1940_v20  ;;  %v2156_v41 = vld [vmem:[#allocation6 + $0x78] sm:$0xff]   ;;  %v2161_v46 = vld [vmem:[#allocation6 + $0x30] sm:$0xff]   ;;  %v2165_v50 = vld [vmem:[#allocation6 + $0x28] sm:$0xff]   ;;  %v104_v20 = vsub.s32 3, %v2419_v10 }
  0x27   :  { %513 = vmatprep.subr.bf16.mxu0 %v1951_v21  ;;  %626 = vmatprep.subr.bf16.mxu1 %v1953_v22  ;;  %v2157_v42 = vld [vmem:[#allocation6 + $0x38] sm:$0xff]   ;;  %v2162_v47 = vld [vmem:[#allocation6 + $0xf0] sm:$0xff]   ;;  %v2166_v51 = vld [vmem:[#allocation6 + $0xe8] sm:$0xff]  }
  0x28   :  { %v2158_v43 = vld [vmem:[#allocation6 + $0xf8] sm:$0xff]   ;;  %v2163_v48 = vld [vmem:[#allocation6 + $0xb0] sm:$0xff]   ;;  %v2167_v52 = vld [vmem:[#allocation6 + $0xa8] sm:$0xff]  }
  0x29   :  { %1954 = vmatmul.mubr.msk.bf16.vlgmr.msra.gmra.mxu0 %vm250_vm0, %v2148_v23  ;;  %1962 = vmatmul.mubr.msk.bf16.vlgmr.msra.gmra.mxu1 %vm250_vm0, %v2148_v23  ;;  %v2159_v44 = vld [vmem:[#allocation6 + $0xb8] sm:$0xff]   ;;  %v2168_v53 = vld [vmem:[#allocation6 + $0x60] sm:$0xff]   ;;  %v2176_v61 = vld [vmem:[#allocation6 + $0x50] sm:$0xff]  }
  0x2a   :  { %514 = vmatpush1.bf16.msra.mxu0 %v1950_v24  ;;  %627 = vmatpush1.bf16.msra.mxu1 %v1952_v25  ;;  %v2169_v54 = vld [vmem:[#allocation6 + $0x20] sm:$0xff]   ;;  %v2172_v57 = vld [vmem:[#allocation6 + $0x58] sm:$0xff]   ;;  %v2177_v62 = vld [vmem:[#allocation6 + $0x10] sm:$0xff]  }
  0x2b   :  { %317 = vmatprep.mubr.bf16.mxu0 %v2292_v0  ;;  %430 = vmatprep.mubr.bf16.mxu1 %v2292_v0  ;;  %v2170_v55 = vld [vmem:[#allocation6 + $0xe0] sm:$0xff]   ;;  %v2173_v58 = vld [vmem:[#allocation6 + $0x18] sm:$0xff]   ;;  %v2178_v63 = vld [vmem:[#allocation6 + $0xd0] sm:$0xff]  }
  0x2c   :  { %515 = vmatprep.subr.bf16.mxu0 %v1943_v29  ;;  %628 = vmatprep.subr.bf16.mxu1 %v1945_v31  ;;  %v2171_v56 = vld [vmem:[#allocation6 + $0xa0] sm:$0xff]   ;;  %v2174_v59 = vld [vmem:[#allocation6 + $0xd8] sm:$0xff]   ;;  %v2180_v1 = vld [vmem:[#allocation6 + $0x48] sm:$0xff]  }
  0x2d   :  { %v2175_v60 = vld [vmem:[#allocation6 + $0x98] sm:$0xff]   ;;  %v2181_v2 = vld [vmem:[#allocation6 + $0x8] sm:$0xff]   ;;  %v2184_v5 = vld [vmem:[#allocation6 + $0x40] sm:$0xff]  }
  0x2e   :  { %516 = vmatpush1.bf16.msra.mxu0 %v1942_v32  ;;  %629 = vmatpush1.bf16.msra.mxu1 %v1944_v34  ;;  %v2182_v3 = vld [vmem:[#allocation6 + $0xc8] sm:$0xff]   ;;  %v2185_v6 = vld [vmem:[#allocation6] sm:$0xff]  }
  0x2f   :  { %2051 = vmatprep.subr.bf16.mxu0 %v2156_v41  ;;  %2073 = vmatprep.subr.bf16.mxu1 %v2158_v43  ;;  %v2183_v4 = vld [vmem:[#allocation6 + $0x88] sm:$0xff]   ;;  %v2186_v7 = vld [vmem:[#allocation6 + $0xc0] sm:$0xff]  }
  0x30   :  { %v2187_v8 = vld [vmem:[#allocation6 + $0x80] sm:$0xff]  }
  0x31   :  { %1955 = vmatmul.mubr.msk.bf16.gmra.mxu0 %vm250_vm0, %v2149_v33  ;;  %1963 = vmatmul.mubr.msk.bf16.gmra.mxu1 %vm250_vm0, %v2149_v33  ;;  %v2425_v16 = vld [vmem:[%s2672_s2] sm:$0xff] }
  0x32   :  { %327 = vmatprep.mubr.bf16.mxu0 %v2292_v0  ;;  %440 = vmatprep.mubr.bf16.mxu1 %v2292_v0  ;;  %v2434_v25 = vrot.slane %v2425_v16, %v100_v17  ;;  %v2437_v27 = vrot.slane %v2425_v16, %v96_v19  ;;  %v2440_v28 = vrot.slane %v2425_v16, %v104_v20 }
  0x39   :  { %1956 = vmatmul.mubr.msk.bf16.gmra.mxu0 %vm250_vm0, %v2150_v35  ;;  %1964 = vmatmul.mubr.msk.bf16.gmra.mxu1 %vm250_vm0, %v2150_v35 }
  0x3a   :  { %337 = vmatprep.mubr.bf16.mxu0 %v2292_v0  ;;  %450 = vmatprep.mubr.bf16.mxu1 %v2292_v0 }
  0x41   :  { %1957 = vmatmul.mubr.msk.bf16.gmra.mxu0 %vm250_vm0, %v2151_v36  ;;  %1965 = vmatmul.mubr.msk.bf16.gmra.mxu1 %vm250_vm0, %v2151_v36 }
  0x42   :  { %347 = vmatprep.mubr.bf16.mxu0 %v2292_v0  ;;  %460 = vmatprep.mubr.bf16.mxu1 %v2292_v0 }
  0x49   :  { %1958 = vmatmul.mubr.msk.bf16.gmra.mxu0 %vm250_vm0, %v2152_v37  ;;  %1966 = vmatmul.mubr.msk.bf16.gmra.mxu1 %vm250_vm0, %v2152_v37 }
  0x4a   :  { %357 = vmatprep.mubr.bf16.mxu0 %v2292_v0  ;;  %470 = vmatprep.mubr.bf16.mxu1 %v2292_v0 }
  0x51   :  { %1959 = vmatmul.mubr.msk.bf16.gmra.mxu0 %vm250_vm0, %v2153_v38  ;;  %1967 = vmatmul.mubr.msk.bf16.gmra.mxu1 %vm250_vm0, %v2153_v38 }
  0x52   :  { %367 = vmatprep.mubr.bf16.mxu0 %v2292_v0  ;;  %480 = vmatprep.mubr.bf16.mxu1 %v2292_v0 }
  0x59   :  { %1960 = vmatmul.mubr.msk.bf16.gmra.mxu0 %vm250_vm0, %v2154_v39  ;;  %1968 = vmatmul.mubr.msk.bf16.gmra.mxu1 %vm250_vm0, %v2154_v39 }
  0x5a   :  { %377 = vmatprep.mubr.bf16.mxu0 %v2292_v0  ;;  %490 = vmatprep.mubr.bf16.mxu1 %v2292_v0 }
  0x61   :  { %1961 = vmatmul.mubr.msk.bf16.gmra.mxu0 %vm250_vm0, %v2155_v40  ;;  %1969 = vmatmul.mubr.msk.bf16.gmra.mxu1 %vm250_vm0, %v2155_v40 }
  0x62   :  { %533 = vmatprep.mubr.bf16.mxu0 %v2292_v0  ;;  %646 = vmatprep.mubr.bf16.mxu1 %v2292_v0 }
  0x69   :  { %1970 = vmatmul.mubr.msk.bf16.vlgmr.msra.gmra.mxu0 %vm250_vm0, %v2148_v23  ;;  %1978 = vmatmul.mubr.msk.bf16.vlgmr.msra.gmra.mxu1 %vm250_vm0, %v2148_v23  ;;  %v2431_v23 = vrot.slane %v2425_v16, %v92_v14 }
  0x6a   :  { %543 = vmatprep.mubr.bf16.mxu0 %v2292_v0  ;;  %656 = vmatprep.mubr.bf16.mxu1 %v2292_v0 }
  0x6b   :  { %2052 = vmatpush3.bf16.msra.mxu0 %v2157_v42  ;;  %2074 = vmatpush3.bf16.msra.mxu1 %v2159_v44 }
  0x6c   :  { %2053 = vmatprep.subr.bf16.mxu0 %v2160_v45  ;;  %2075 = vmatprep.subr.bf16.mxu1 %v2162_v47  ;;  %v2293_v47 = vmov 1983009808  }
  0x6f   :  { %2054 = vmatpush3.bf16.msra.mxu0 %v2161_v46  ;;  %2076 = vmatpush3.bf16.msra.mxu1 %v2163_v48  ;;  %v2452_v48 = vunpack.c.l.s4 %v2293_v47 }
  0x70   :  { %2055 = vmatprep.subr.bf16.mxu0 %v2164_v49  ;;  %2077 = vmatprep.subr.bf16.mxu1 %v2166_v51 }
  0x71   :  { %1971 = vmatmul.mubr.msk.bf16.gmra.mxu0 %vm250_vm0, %v2149_v33  ;;  %1979 = vmatmul.mubr.msk.bf16.gmra.mxu1 %vm250_vm0, %v2149_v33 }
  0x72   :  { %553 = vmatprep.mubr.bf16.mxu0 %v2292_v0  ;;  %666 = vmatprep.mubr.bf16.mxu1 %v2292_v0 }
  0x73   :  { %2056 = vmatpush3.bf16.msra.mxu0 %v2165_v50  ;;  %2078 = vmatpush3.bf16.msra.mxu1 %v2167_v52 }
  0x74   :  { %2057 = vmatprep.subr.bf16.mxu0 %v2168_v53  ;;  %2079 = vmatprep.subr.bf16.mxu1 %v2170_v55 }
  0x77   :  { %2058 = vmatpush3.bf16.msra.mxu0 %v2169_v54  ;;  %2080 = vmatpush3.bf16.msra.mxu1 %v2171_v56 }
  0x78   :  { %2059 = vmatprep.subr.bf16.mxu0 %v2172_v57  ;;  %2081 = vmatprep.subr.bf16.mxu1 %v2174_v59 }
  0x79   :  { %1972 = vmatmul.mubr.msk.bf16.gmra.mxu0 %vm250_vm0, %v2150_v35  ;;  %1980 = vmatmul.mubr.msk.bf16.gmra.mxu1 %vm250_vm0, %v2150_v35 }
  0x7a   :  { %563 = vmatprep.mubr.bf16.mxu0 %v2292_v0  ;;  %676 = vmatprep.mubr.bf16.mxu1 %v2292_v0 }
  0x7b   :  { %2060 = vmatpush3.bf16.msra.mxu0 %v2173_v58  ;;  %2082 = vmatpush3.bf16.msra.mxu1 %v2175_v60 }
  0x7c   :  { %2061 = vmatprep.subr.bf16.mxu0 %v2176_v61  ;;  %2083 = vmatprep.subr.bf16.mxu1 %v2178_v63 }
  0x7f   :  { %2062 = vmatpush3.bf16.msra.mxu0 %v2177_v62 }
  0x80   :  { %2063 = vmatprep.subr.bf16.mxu0 %v2180_v1 }
  0x81   :  { %1973 = vmatmul.mubr.msk.bf16.gmra.mxu0 %vm250_vm0, %v2151_v36  ;;  %1981 = vmatmul.mubr.msk.bf16.gmra.mxu1 %vm250_vm0, %v2151_v36 }
  0x82   :  { %573 = vmatprep.mubr.bf16.mxu0 %v2292_v0  ;;  %686 = vmatprep.mubr.bf16.mxu1 %v2292_v0 }
  0x83   :  { %2064 = vmatpush3.bf16.msra.mxu0 %v2181_v2 }
  0x84   :  { %2065 = vmatprep.subr.bf16.mxu0 %v2184_v5 }
  0x87   :  { %2066 = vmatpush3.bf16.msra.mxu0 %v2185_v6 }
  0x89   :  { %1974 = vmatmul.mubr.msk.bf16.gmra.mxu0 %vm250_vm0, %v2152_v37  ;;  %1982 = vmatmul.mubr.msk.bf16.gmra.mxu1 %vm250_vm0, %v2152_v37 }
  0x8a   :  { %583 = vmatprep.mubr.bf16.mxu0 %v2292_v0  ;;  %696 = vmatprep.mubr.bf16.mxu1 %v2292_v0 }
  0x91   :  { %1975 = vmatmul.mubr.msk.bf16.gmra.mxu0 %vm250_vm0, %v2153_v38  ;;  %1983 = vmatmul.mubr.msk.bf16.gmra.mxu1 %vm250_vm0, %v2153_v38 }
  0x92   :  { %593 = vmatprep.mubr.bf16.mxu0 %v2292_v0  ;;  %706 = vmatprep.mubr.bf16.mxu1 %v2292_v0 }
  0x99   :  { %1976 = vmatmul.mubr.msk.bf16.gmra.mxu0 %vm250_vm0, %v2154_v39  ;;  %1984 = vmatmul.mubr.msk.bf16.gmra.mxu1 %vm250_vm0, %v2154_v39 }
  0x9a   :  { %603 = vmatprep.mubr.bf16.mxu0 %v2292_v0  ;;  %716 = vmatprep.mubr.bf16.mxu1 %v2292_v0  ;;  %v2179_v0 = vld [vmem:[#allocation6 + $0x90] sm:$0xff]  }
  0x9b   :  { %2084 = vmatpush3.bf16.msra.mxu1 %v2179_v0  ;;  %v2188_v0 = vld [vmem:[#allocation6 + $0x178] sm:$0xff]  }
  0x9c   :  { %2085 = vmatprep.subr.bf16.mxu1 %v2182_v3  ;;  %2095 = vmatprep.subr.bf16.mxu0 %v2188_v0 }
  0x9f   :  { %2086 = vmatpush3.bf16.msra.mxu1 %v2183_v4 }
  0xa0   :  { %2087 = vmatprep.subr.bf16.mxu1 %v2186_v7 }
  0xa1   :  { %1977 = vmatmul.mubr.msk.bf16.gmra.mxu0 %vm250_vm0, %v2155_v40  ;;  %1985 = vmatmul.mubr.msk.bf16.gmra.mxu1 %vm250_vm0, %v2155_v40 }
  0xa3   :  { %2088 = vmatpush3.bf16.msra.mxu1 %v2187_v8 }
  0xe9   :  { %v309_v11 = vpop.f32.mrf.mxu0  ;;  %v422_v12 = vpop.f32.mrf.mxu1 }
  0xea   :  { %v310_v33 = vadd.f32 %v309_v11, %v2431_v23  ;;  %v423_v36 = vadd.f32 %v422_v12, %v2434_v25  ;;  %v2190_v12 = vld [vmem:[#allocation6 + $0x1f8] sm:$0xff]  }
  0xeb   :  { %v311_v13 = vpop.f32.mrf.mxu0  ;;  %v424_v15 = vpop.f32.mrf.mxu1  ;;  %2117 = vmatprep.subr.bf16.mxu1 %v2190_v12 }
  0xec   :  { %v312_v39 = vadd.f32 %v311_v13, %v2437_v27  ;;  %v425_v40 = vadd.f32 %v424_v15, %v2440_v28  ;;  %v727_v49 = vmax.f32 %v310_v33, 0.0  ;;  %v729_v54 = vmax.f32 %v423_v36, 0.0 }
  0xed   :  { %v313_v18 = vpop.f32.mrf.mxu0  ;;  %v426_v21 = vpop.f32.mrf.mxu1 }
  0xee   :  { %v314_v30 = vadd.f32 %v313_v18, %v2431_v23  ;;  %v427_v31 = vadd.f32 %v426_v21, %v2434_v25  ;;  %v728_v59 = vmax.f32 %v312_v39, 0.0  ;;  %v730_v60 = vmax.f32 %v425_v40, 0.0 }
  0xef   :  { %v315_v22 = vpop.f32.mrf.mxu0  ;;  %v428_v24 = vpop.f32.mrf.mxu1 }
  0xf0   :  { %v316_v34 = vadd.f32 %v315_v22, %v2437_v27  ;;  %v429_v37 = vadd.f32 %v428_v24, %v2440_v28  ;;  %v735_v43 = vmax.f32 %v314_v30, 0.0  ;;  %v737_v44 = vmax.f32 %v427_v31, 0.0 }
  0xf1   :  { %v319_v26 = vpop.f32.mrf.mxu0  ;;  %v432_v29 = vpop.f32.mrf.mxu1 }
  0xf2   :  { %v320_v41 = vadd.f32 %v319_v26, %v2431_v23  ;;  %v433_v45 = vadd.f32 %v432_v29, %v2434_v25  ;;  %v736_v50 = vmax.f32 %v316_v34, 0.0  ;;  %v738_v55 = vmax.f32 %v429_v37, 0.0 }
  0xf3   :  { %v321_v32 = vpop.f32.mrf.mxu0  ;;  %v434_v35 = vpop.f32.mrf.mxu1  ;;  %v857_v1 = vadd.f32 %v735_v43, %v727_v49  ;;  %v883_v2 = vadd.f32 %v737_v44, %v729_v54 }
  0xf4   :  { %v322_v51 = vadd.f32 %v321_v32, %v2437_v27  ;;  %v435_v52 = vadd.f32 %v434_v35, %v2440_v28  ;;  %v743_v61 = vmax.f32 %v320_v41, 0.0  ;;  %v745_v3 = vmax.f32 %v433_v45, 0.0 }
  0xf5   :  { %v323_v38 = vpop.f32.mrf.mxu0  ;;  %v436_v42 = vpop.f32.mrf.mxu1  ;;  %v870_v6 = vadd.f32 %v736_v50, %v728_v59  ;;  %v896_v13 = vadd.f32 %v738_v55, %v730_v60 }
  0xf6   :  { %v324_v56 = vadd.f32 %v323_v38, %v2431_v23  ;;  %v437_v57 = vadd.f32 %v436_v42, %v2434_v25  ;;  %v744_v7 = vmax.f32 %v322_v51, 0.0  ;;  %v746_v8 = vmax.f32 %v435_v52, 0.0 }
  0xf7   :  { %v325_v46 = vpop.f32.mrf.mxu0  ;;  %v438_v53 = vpop.f32.mrf.mxu1  ;;  %v858_v19 = vadd.f32 %v857_v1, %v743_v61  ;;  %v884_v26 = vadd.f32 %v883_v2, %v745_v3 }
  0xf8   :  { %v326_v62 = vadd.f32 %v325_v46, %v2437_v27  ;;  %v439_v4 = vadd.f32 %v438_v53, %v2440_v28  ;;  %v751_v14 = vmax.f32 %v324_v56, 0.0  ;;  %v753_v15 = vmax.f32 %v437_v57, 0.0 }
  0xf9   :  { %v329_v58 = vpop.f32.mrf.mxu0  ;;  %v442_v63 = vpop.f32.mrf.mxu1  ;;  %v871_v33 = vadd.f32 %v870_v6, %v744_v7  ;;  %v897_v34 = vadd.f32 %v896_v13, %v746_v8 }
  0xfa   :  { %v330_v9 = vadd.f32 %v329_v58, %v2431_v23  ;;  %v443_v17 = vadd.f32 %v442_v63, %v2434_v25  ;;  %v752_v20 = vmax.f32 %v326_v62, 0.0  ;;  %v754_v29 = vmax.f32 %v439_v4, 0.0 }
  0xfb   :  { %v331_v5 = vpop.f32.mrf.mxu0  ;;  %v444_v11 = vpop.f32.mrf.mxu1  ;;  %v859_v38 = vadd.f32 %v858_v19, %v751_v14  ;;  %v885_v39 = vadd.f32 %v884_v26, %v753_v15 }
  0xfc   :  { %v332_v21 = vadd.f32 %v331_v5, %v2437_v27  ;;  %v445_v30 = vadd.f32 %v444_v11, %v2440_v28  ;;  %v759_v35 = vmax.f32 %v330_v9, 0.0  ;;  %v761_v40 = vmax.f32 %v443_v17, 0.0 }
  0xfd   :  { %v333_v18 = vpop.f32.mrf.mxu0  ;;  %v446_v24 = vpop.f32.mrf.mxu1  ;;  %v872_v43 = vadd.f32 %v871_v33, %v752_v20  ;;  %v898_v49 = vadd.f32 %v897_v34, %v754_v29 }
  0xfe   :  { %v334_v22 = vadd.f32 %v333_v18, %v2431_v23  ;;  %v447_v31 = vadd.f32 %v446_v24, %v2434_v25  ;;  %v760_v44 = vmax.f32 %v332_v21, 0.0  ;;  %v762_v50 = vmax.f32 %v445_v30, 0.0 }
  0xff   :  { %v335_v32 = vpop.f32.mrf.mxu0  ;;  %v448_v37 = vpop.f32.mrf.mxu1  ;;  %v860_v54 = vadd.f32 %v859_v38, %v759_v35  ;;  %v886_v59 = vadd.f32 %v885_v39, %v761_v40 }
 0x100   :  { %v336_v36 = vadd.f32 %v335_v32, %v2437_v27  ;;  %v449_v41 = vadd.f32 %v448_v37, %v2440_v28  ;;  %v767_v45 = vmax.f32 %v334_v22, 0.0  ;;  %v769_v51 = vmax.f32 %v447_v31, 0.0 }
 0x101   :  { %v339_v42 = vpop.f32.mrf.mxu0  ;;  %v452_v47 = vpop.f32.mrf.mxu1  ;;  %v873_v0 = vadd.f32 %v872_v43, %v760_v44  ;;  %v899_v5 = vadd.f32 %v898_v49, %v762_v50  ;;  %v1085_v32 = vunpack.c.0.s8 %v2452_v48  ;;  %v108_v49 = vsub.s32 4, %v2419_v10 }
 0x102   :  { %v340_v46 = vadd.f32 %v339_v42, %v2431_v23  ;;  %v453_v52 = vadd.f32 %v452_v47, %v2434_v25  ;;  %v768_v55 = vmax.f32 %v336_v36, 0.0  ;;  %v770_v60 = vmax.f32 %v449_v41, 0.0 }
 0x103   :  { %v341_v53 = vpop.f32.mrf.mxu0  ;;  %v454_v58 = vpop.f32.mrf.mxu1  ;;  %v861_v1 = vadd.f32 %v860_v54, %v767_v45  ;;  %v887_v6 = vadd.f32 %v886_v59, %v769_v51  ;;  %v2478_v45 = vsub.s32 %v1085_v32, %v2419_v10 }
 0x104   :  { %v775_v56 = vmax.f32 %v340_v46, 0.0  ;;  %v342_v57 = vadd.f32 %v341_v53, %v2437_v27  ;;  %v777_v61 = vmax.f32 %v453_v52, 0.0  ;;  %v455_v62 = vadd.f32 %v454_v58, %v2440_v28 }
 0x105   :  { %v343_v63 = vpop.f32.mrf.mxu0  ;;  %v456_v4 = vpop.f32.mrf.mxu1  ;;  %v874_v11 = vadd.f32 %v873_v0, %v768_v55  ;;  %v900_v17 = vadd.f32 %v899_v5, %v770_v60  ;;  %v116_v58 = vsub.s32 6, %v2419_v10 }
 0x106   :  { %v776_v2 = vmax.f32 %v342_v57, 0.0  ;;  %v344_v3 = vadd.f32 %v343_v63, %v2431_v23  ;;  %v778_v7 = vmax.f32 %v455_v62, 0.0  ;;  %v457_v8 = vadd.f32 %v456_v4, %v2434_v25 }
 0x107   :  { %v345_v9 = vpop.f32.mrf.mxu0  ;;  %v862_v12 = vadd.f32 %v861_v1, %v775_v56  ;;  %v458_v15 = vpop.f32.mrf.mxu1  ;;  %v888_v18 = vadd.f32 %v887_v6, %v777_v61  ;;  %v112_v63 = vsub.s32 5, %v2419_v10 }
 0x108   :  { %v783_v13 = vmax.f32 %v344_v3, 0.0  ;;  %v346_v14 = vadd.f32 %v345_v9, %v2437_v27  ;;  %v785_v19 = vmax.f32 %v457_v8, 0.0  ;;  %v459_v20 = vadd.f32 %v458_v15, %v2440_v28 }
 0x109   :  { %v349_v21 = vpop.f32.mrf.mxu0  ;;  %v875_v22 = vadd.f32 %v874_v11, %v776_v2  ;;  %v462_v29 = vpop.f32.mrf.mxu1  ;;  %v901_v30 = vadd.f32 %v900_v17, %v778_v7  ;;  %v120_v9 = vsub.s32 7, %v2419_v10 }
 0x10a   :  { %v863_v24 = vadd.f32 %v862_v12, %v783_v13  ;;  %v784_v26 = vmax.f32 %v346_v14, 0.0  ;;  %v889_v31 = vadd.f32 %v888_v18, %v785_v19  ;;  %v786_v33 = vmax.f32 %v459_v20, 0.0 }
 0x10b   :  { %v351_v34 = vpop.f32.mrf.mxu0  ;;  %v464_v37 = vpop.f32.mrf.mxu1  ;;  %v350_v51 = vadd.f32 %v349_v21, %v2431_v23  ;;  %v463_v55 = vadd.f32 %v462_v29, %v2434_v25 }
 0x10c   :  { %v864_v35 = vrot.slane %v863_v24, 4  ;;  %v876_v36 = vadd.f32 %v875_v22, %v784_v26  ;;  %v890_v38 = vrot.slane %v889_v31, 4  ;;  %v902_v39 = vadd.f32 %v901_v30, %v786_v33 }
 0x10d   :  { %v353_v40 = vpop.f32.mrf.mxu0  ;;  %v466_v43 = vpop.f32.mrf.mxu1  ;;  %v352_v60 = vadd.f32 %v351_v34, %v2437_v27  ;;  %v465_v2 = vadd.f32 %v464_v37, %v2440_v28  ;;  %v791_v6 = vmax.f32 %v350_v51, 0.0  ;;  %v793_v12 = vmax.f32 %v463_v55, 0.0 }
 0x10e   :  { %v865_v41 = vadd.f32 %v864_v35, %v863_v24  ;;  %v877_v42 = vrot.slane %v876_v36, 4  ;;  %v891_v44 = vadd.f32 %v890_v38, %v889_v31  ;;  %v903_v46 = vrot.slane %v902_v39, 4 }
 0x10f   :  { %v355_v47 = vpop.f32.mrf.mxu0  ;;  %v354_v52 = vadd.f32 %v353_v40, %v2431_v23  ;;  %v468_v53 = vpop.f32.mrf.mxu1  ;;  %v467_v56 = vadd.f32 %v466_v43, %v2434_v25  ;;  %v792_v18 = vmax.f32 %v352_v60, 0.0  ;;  %v794_v24 = vmax.f32 %v465_v2, 0.0 }
 0x110   :  { %v866_v48 = vrot.slane %v865_v41, 2  ;;  %v878_v50 = vadd.f32 %v877_v42, %v876_v36  ;;  %v904_v54 = vadd.f32 %v903_v46, %v902_v39  ;;  %v356_v61 = vadd.f32 %v355_v47, %v2437_v27 }
 0x111   :  { %v359_v57 = vpop.f32.mrf.mxu0  ;;  %v472_v62 = vpop.f32.mrf.mxu1  ;;  %v892_v0 = vrot.slane %v891_v44, 2  ;;  %v469_v3 = vadd.f32 %v468_v53, %v2440_v28  ;;  %v799_v7 = vmax.f32 %v354_v52, 0.0  ;;  %v801_v13 = vmax.f32 %v467_v56, 0.0 }
 0x112   :  { %v879_v59 = vrot.slane %v878_v50, 2  ;;  %v905_v1 = vrot.slane %v904_v54, 2  ;;  %v867_v5 = vadd.f32 %v866_v48, %v865_v41  ;;  %v360_v14 = vadd.f32 %v359_v57, %v2431_v23 }
 0x113   :  { %v361_v4 = vpop.f32.mrf.mxu0  ;;  %v474_v8 = vpop.f32.mrf.mxu1  ;;  %v800_v19 = vmax.f32 %v356_v61, 0.0  ;;  %v473_v20 = vadd.f32 %v472_v62, %v2434_v25  ;;  %v2494_v22 = vadd.f32 %v892_v0, %v891_v44  ;;  %v802_v26 = vmax.f32 %v469_v3, 0.0 }
 0x114   :  { %v880_v11 = vadd.f32 %v879_v59, %v878_v50  ;;  %v906_v17 = vadd.f32 %v905_v1, %v904_v54  ;;  %v362_v29 = vadd.f32 %v361_v4, %v2437_v27  ;;  %v868_v31 = vrot.slane %v867_v5, 1 }
 0x115   :  { %v363_v15 = vpop.f32.mrf.mxu0  ;;  %v476_v21 = vpop.f32.mrf.mxu1  ;;  %v961_v32 = vadd.f32 %v799_v7, %v791_v6  ;;  %v475_v33 = vadd.f32 %v474_v8, %v2440_v28  ;;  %v987_v37 = vadd.f32 %v801_v13, %v793_v12  ;;  %v807_v38 = vmax.f32 %v360_v14, 0.0 }
 0x116   :  { %v364_v34 = vadd.f32 %v363_v15, %v2431_v23  ;;  %v881_v36 = vrot.slane %v880_v11, 1  ;;  %v477_v39 = vadd.f32 %v476_v21, %v2434_v25  ;;  %v907_v41 = vrot.slane %v906_v17, 1 }
 0x117   :  { %v365_v30 = vpop.f32.mrf.mxu0  ;;  %v478_v35 = vpop.f32.mrf.mxu1  ;;  %v974_v42 = vadd.f32 %v800_v19, %v792_v18  ;;  %v809_v43 = vmax.f32 %v473_v20, 0.0  ;;  %v894_v47 = vrot.slane %v2494_v22, 1  ;;  %v1000_v48 = vadd.f32 %v802_v26, %v794_v24 }
 0x118   :  { %v366_v44 = vadd.f32 %v365_v30, %v2437_v27  ;;  %v808_v50 = vmax.f32 %v362_v29, 0.0  ;;  %v479_v51 = vadd.f32 %v478_v35, %v2440_v28  ;;  %v2503_v53 = vadd.f32 %v868_v31, %v867_v5 }
 0x119   :  { %v369_v40 = vpop.f32.mrf.mxu0  ;;  %v482_v46 = vpop.f32.mrf.mxu1  ;;  %v810_v54 = vmax.f32 %v475_v33, 0.0  ;;  %v815_v55 = vmax.f32 %v364_v34, 0.0  ;;  %v2506_v59 = vadd.f32 %v881_v36, %v880_v11  ;;  %v962_v60 = vadd.f32 %v961_v32, %v807_v38 }
 0x11a   :  { %v370_v56 = vadd.f32 %v369_v40, %v2431_v23  ;;  %v817_v61 = vmax.f32 %v477_v39, 0.0  ;;  %v483_v62 = vadd.f32 %v482_v46, %v2434_v25  ;;  %v2509_v1 = vadd.f32 %v907_v41, %v906_v17 }
 0x11b   :  { %v371_v52 = vpop.f32.mrf.mxu0  ;;  %v484_v57 = vpop.f32.mrf.mxu1  ;;  %v988_v2 = vadd.f32 %v987_v37, %v809_v43  ;;  %v816_v3 = vmax.f32 %v366_v44, 0.0  ;;  %v975_v6 = vadd.f32 %v974_v42, %v808_v50  ;;  %v818_v7 = vmax.f32 %v479_v51, 0.0 }
 0x11c   :  { %v372_v4 = vadd.f32 %v371_v52, %v2437_v27  ;;  %v485_v8 = vadd.f32 %v484_v57, %v2440_v28  ;;  %v1001_v13 = vadd.f32 %v1000_v48, %v810_v54  ;;  %v963_v14 = vadd.f32 %v962_v60, %v815_v55 }
 0x11d   :  { %v373_v0 = vpop.f32.mrf.mxu0  ;;  %v486_v5 = vpop.f32.mrf.mxu1  ;;  %v823_v15 = vmax.f32 %v370_v56, 0.0  ;;  %v989_v17 = vadd.f32 %v988_v2, %v817_v61  ;;  %v825_v20 = vmax.f32 %v483_v62, 0.0  ;;  %v976_v29 = vadd.f32 %v975_v6, %v816_v3 }
 0x11e   :  { %v374_v12 = vadd.f32 %v373_v0, %v2431_v23  ;;  %v487_v18 = vadd.f32 %v486_v5, %v2434_v25  ;;  %v824_v30 = vmax.f32 %v372_v4, 0.0  ;;  %v1002_v34 = vadd.f32 %v1001_v13, %v818_v7 }
 0x11f   :  { %v375_v11 = vpop.f32.mrf.mxu0  ;;  %v488_v19 = vpop.f32.mrf.mxu1  ;;  %v826_v35 = vmax.f32 %v485_v8, 0.0  ;;  %v964_v39 = vadd.f32 %v963_v14, %v823_v15  ;;  %v990_v44 = vadd.f32 %v989_v17, %v825_v20  ;;  %v1081_v17 = vcombine.low %v2503_v53, %v2506_v59 }
 0x120   :  { %v376_v21 = vadd.f32 %v375_v11, %v2437_v27  ;;  %v489_v24 = vadd.f32 %v488_v19, %v2440_v28  ;;  %v831_v31 = vmax.f32 %v374_v12, 0.0  ;;  %v833_v36 = vmax.f32 %v487_v18, 0.0 }
 0x121   :  { %v379_v26 = vpop.f32.mrf.mxu0  ;;  %v492_v33 = vpop.f32.mrf.mxu1  ;;  %v977_v52 = vadd.f32 %v976_v29, %v824_v30  ;;  %v1003_v60 = vadd.f32 %v1002_v34, %v826_v35  ;;  %v2534_v30 = vrot.slane %v2425_v16, %v108_v49  ;;  %v2539_v53 = vrot.slane %v2425_v16, %v116_v58 }
 0x122   :  { %v380_v32 = vadd.f32 %v379_v26, %v2431_v23  ;;  %v493_v37 = vadd.f32 %v492_v33, %v2434_v25  ;;  %v832_v40 = vmax.f32 %v376_v21, 0.0  ;;  %v834_v46 = vmax.f32 %v489_v24, 0.0 }
 0x123   :  { %v381_v38 = vpop.f32.mrf.mxu0  ;;  %v494_v43 = vpop.f32.mrf.mxu1  ;;  %v965_v54 = vadd.f32 %v964_v39, %v831_v31  ;;  %v991_v61 = vadd.f32 %v990_v44, %v833_v36  ;;  %v2549_v49 = vrot.slane %v2425_v16, %v120_v9  ;;  %v2552_v35 = vrot.slane %v1081_v17, %v2478_v45 }
 0x124   :  { %v839_v41 = vmax.f32 %v380_v32, 0.0  ;;  %v382_v42 = vadd.f32 %v381_v38, %v2437_v27  ;;  %v841_v48 = vmax.f32 %v493_v37, 0.0  ;;  %v495_v50 = vadd.f32 %v494_v43, %v2440_v28 }
 0x125   :  { %v383_v51 = vpop.f32.mrf.mxu0  ;;  %v496_v57 = vpop.f32.mrf.mxu1  ;;  %v978_v3 = vadd.f32 %v977_v52, %v832_v40  ;;  %v1004_v8 = vadd.f32 %v1003_v60, %v834_v46 }
 0x126   :  { %v840_v55 = vmax.f32 %v382_v42, 0.0  ;;  %v384_v56 = vadd.f32 %v383_v51, %v2431_v23  ;;  %v842_v62 = vmax.f32 %v495_v50, 0.0  ;;  %v497_v0 = vadd.f32 %v496_v57, %v2434_v25 }
 0x127   :  { %v385_v2 = vpop.f32.mrf.mxu0  ;;  %v966_v4 = vadd.f32 %v965_v54, %v839_v41  ;;  %v498_v7 = vpop.f32.mrf.mxu1  ;;  %v992_v12 = vadd.f32 %v991_v61, %v841_v48  ;;  %v895_v23 = vadd.f32 %v894_v47, %v2494_v22 }
 0x128   :  { %v847_v5 = vmax.f32 %v384_v56, 0.0  ;;  %v386_v6 = vadd.f32 %v385_v2, %v2437_v27  ;;  %v849_v11 = vmax.f32 %v497_v0, 0.0  ;;  %v499_v13 = vadd.f32 %v498_v7, %v2440_v28 }
 0x129   :  { %v535_v14 = vpop.f32.mrf.mxu0  ;;  %v979_v15 = vadd.f32 %v978_v3, %v840_v55  ;;  %v648_v19 = vpop.f32.mrf.mxu1  ;;  %v1005_v20 = vadd.f32 %v1004_v8, %v842_v62  ;;  %v1082_v26 = vcombine.low %v895_v23, %v2509_v1  ;;  %v2544_v1 = vrot.slane %v2425_v16, %v112_v63 }
 0x12a   :  { %v967_v18 = vadd.f32 %v966_v4, %v847_v5  ;;  %v848_v25 = vmax.f32 %v386_v6, 0.0  ;;  %v993_v27 = vadd.f32 %v992_v12, %v849_v11  ;;  %v850_v21 = vmax.f32 %v499_v13, 0.0 }
 0x12b   :  { %v537_v24 = vpop.f32.mrf.mxu0  ;;  %v650_v22 = vpop.f32.mrf.mxu1  ;;  %v2556_v39 = vrot.slane %v1082_v26, %v2478_v45  ;;  %v536_v41 = vadd.f32 %v535_v14, %v2534_v30  ;;  %v649_v9 = vadd.f32 %v648_v19, %v2539_v53 }
 0x12c   :  { %v968_v29 = vrot.slane %v967_v18, 4  ;;  %v980_v28 = vadd.f32 %v979_v15, %v848_v25  ;;  %v994_v47 = vrot.slane %v993_v27, 4  ;;  %v1006_v31 = vadd.f32 %v1005_v20, %v850_v21 }
 0x12d   :  { %v539_v59 = vpop.f32.mrf.mxu0  ;;  %v652_v34 = vpop.f32.mrf.mxu1  ;;  %v538_v48 = vadd.f32 %v537_v24, %v2544_v1  ;;  %v651_v50 = vadd.f32 %v650_v22, %v2549_v49  ;;  %v1097_v60 = vcombine.low %v2552_v35, %v2556_v39  ;;  %v731_v0 = vmax.f32 %v536_v41, 0.0 }
 0x12e   :  { %v969_v32 = vadd.f32 %v968_v29, %v967_v18  ;;  %v981_v33 = vrot.slane %v980_v28, 4  ;;  %v995_v36 = vadd.f32 %v994_v47, %v993_v27  ;;  %v1007_v58 = vrot.slane %v1006_v31, 4 }
 0x12f   :  { %v540_v37 = vadd.f32 %v539_v59, %v2534_v30  ;;  %v541_v38 = vpop.f32.mrf.mxu0  ;;  %v654_v10 = vpop.f32.mrf.mxu1  ;;  %v653_v56 = vadd.f32 %v652_v34, %v2539_v53  ;;  %v733_v5 = vmax.f32 %v649_v9, 0.0  ;;  %v732_v12 = vmax.f32 %v538_v48, 0.0 }
 0x130   :  { %v970_v40 = vrot.slane %v969_v32, 2  ;;  %v982_v63 = vadd.f32 %v981_v33, %v980_v28  ;;  %v996_v42 = vrot.slane %v995_v36, 2  ;;  %v1008_v16 = vadd.f32 %v1007_v58, %v1006_v31 }
 0x131   :  { %v545_v43 = vpop.f32.mrf.mxu0  ;;  %v658_v51 = vpop.f32.mrf.mxu1  ;;  %v739_v55 = vmax.f32 %v540_v37, 0.0  ;;  %v542_v6 = vadd.f32 %v541_v38, %v2544_v1  ;;  %v655_v11 = vadd.f32 %v654_v10, %v2549_v49  ;;  %v734_v15 = vmax.f32 %v651_v50, 0.0 }
 0x132   :  { %v971_v44 = vadd.f32 %v970_v40, %v969_v32  ;;  %v983_v46 = vrot.slane %v982_v63, 2  ;;  %v997_v52 = vadd.f32 %v996_v42, %v995_v36  ;;  %v1009_v54 = vrot.slane %v1008_v16, 2 }
 0x133   :  { %v547_v57 = vpop.f32.mrf.mxu0  ;;  %v660_v2 = vpop.f32.mrf.mxu1  ;;  %v546_v13 = vadd.f32 %v545_v43, %v2534_v30  ;;  %v909_v18 = vadd.f32 %v739_v55, %v731_v0  ;;  %v741_v25 = vmax.f32 %v653_v56, 0.0  ;;  %v659_v27 = vadd.f32 %v658_v51, %v2539_v53 }
 0x134   :  { %v972_v61 = vrot.slane %v971_v44, 1  ;;  %v984_v62 = vadd.f32 %v983_v46, %v982_v63  ;;  %v998_v3 = vrot.slane %v997_v52, 1  ;;  %v1010_v4 = vadd.f32 %v1009_v54, %v1008_v16 }
 0x135   :  { %v549_v7 = vpop.f32.mrf.mxu0  ;;  %v662_v14 = vpop.f32.mrf.mxu1  ;;  %v548_v21 = vadd.f32 %v547_v57, %v2544_v1  ;;  %v740_v28 = vmax.f32 %v542_v6, 0.0  ;;  %v661_v22 = vadd.f32 %v660_v2, %v2549_v49  ;;  %v742_v59 = vmax.f32 %v655_v11, 0.0 }
 0x136   :  { %v985_v8 = vrot.slane %v984_v62, 1  ;;  %v1011_v23 = vrot.slane %v1010_v4, 1  ;;  %v973_v17 = vadd.f32 %v972_v61, %v971_v44  ;;  %v999_v26 = vadd.f32 %v998_v3, %v997_v52 }
 0x137   :  { %v551_v19 = vpop.f32.mrf.mxu0  ;;  %v664_v24 = vpop.f32.mrf.mxu1  ;;  %v747_v32 = vmax.f32 %v546_v13, 0.0  ;;  %v550_v33 = vadd.f32 %v549_v7, %v2534_v30  ;;  %v663_v58 = vadd.f32 %v662_v14, %v2539_v53  ;;  %v749_v41 = vmax.f32 %v659_v27, 0.0 }
 0x138   :  { %v986_v20 = vadd.f32 %v985_v8, %v984_v62  ;;  %v1012_v29 = vadd.f32 %v1011_v23, %v1010_v4  ;;  %v552_v37 = vadd.f32 %v551_v19, %v2544_v1  ;;  %v665_v38 = vadd.f32 %v664_v24, %v2549_v49 }
 0x139   :  { %v555_v47 = vpop.f32.mrf.mxu0  ;;  %v668_v34 = vpop.f32.mrf.mxu1  ;;  %v748_v10 = vmax.f32 %v548_v21, 0.0  ;;  %v935_v43 = vadd.f32 %v741_v25, %v733_v5  ;;  %v750_v44 = vmax.f32 %v661_v22, 0.0  ;;  %v922_v50 = vadd.f32 %v740_v28, %v732_v12 }
 0x13a   :  { %v1115_v31 = vcombine.low %v973_v17, %v986_v20  ;;  %v1116_v36 = vcombine.low %v999_v26, %v1012_v29  ;;  %v556_v42 = vadd.f32 %v555_v47, %v2534_v30  ;;  %v669_v46 = vadd.f32 %v668_v34, %v2539_v53 }
 0x13b   :  { %v557_v40 = vpop.f32.mrf.mxu0  ;;  %v670_v16 = vpop.f32.mrf.mxu1  ;;  %v948_v51 = vadd.f32 %v742_v59, %v734_v15  ;;  %v755_v52 = vmax.f32 %v550_v33, 0.0  ;;  %v757_v57 = vmax.f32 %v663_v58, 0.0  ;;  %v756_v61 = vmax.f32 %v552_v37, 0.0 }
 0x13c   :  { %v1123_v63 = vrot.slane %v1115_v31, %v2478_v45  ;;  %v1130_v9 = vrot.slane %v1116_v36, %v2478_v45  ;;  %v558_v54 = vadd.f32 %v557_v40, %v2544_v1  ;;  %v758_v62 = vmax.f32 %v665_v38, 0.0 }
 0x13d   :  { %v559_v48 = vpop.f32.mrf.mxu0  ;;  %v672_v55 = vpop.f32.mrf.mxu1  ;;  %v910_v2 = vadd.f32 %v909_v18, %v747_v32  ;;  %v936_v3 = vadd.f32 %v935_v43, %v749_v41  ;;  %v923_v4 = vadd.f32 %v922_v50, %v748_v10  ;;  %v763_v5 = vmax.f32 %v556_v42, 0.0 }
 0x13e   :  { %v1131_v56 = vcombine.low %v1123_v63, %v1130_v9  ;;  %v949_v8 = vadd.f32 %v948_v51, %v750_v44  ;;  %v765_v11 = vmax.f32 %v669_v46, 0.0  ;;  %v671_v12 = vadd.f32 %v670_v16, %v2549_v49 }
 0x13f   :  { %v561_v0 = vpop.f32.mrf.mxu0  ;;  %v674_v6 = vpop.f32.mrf.mxu1  ;;  %v911_v14 = vadd.f32 %v910_v2, %v755_v52  ;;  %v764_v23 = vmax.f32 %v558_v54, 0.0  ;;  %v560_v15 = vadd.f32 %v559_v48, %v2534_v30  ;;  %v937_v17 = vadd.f32 %v936_v3, %v757_v57 }
 0x140   :  { %v1153_v7 = vrot.slane %v1131_v56, 7  ;;  %v562_v25 = vadd.f32 %v561_v0, %v2544_v1  ;;  %v924_v20 = vadd.f32 %v923_v4, %v756_v61  ;;  %v950_v18 = vadd.f32 %v949_v8, %v758_v62 }
 0x141   :  { %v565_v13 = vpop.f32.mrf.mxu0  ;;  %v678_v19 = vpop.f32.mrf.mxu1  ;;  %v673_v27 = vadd.f32 %v672_v55, %v2539_v53  ;;  %v912_v24 = vadd.f32 %v911_v14, %v763_v5  ;;  %v675_v26 = vadd.f32 %v674_v6, %v2549_v49  ;;  %v938_v47 = vadd.f32 %v937_v17, %v765_v11 }
 0x142   :  { %v1155_v22 = vsel %vm1154_vm1, %v1153_v7, %v1097_v60  ;;  %v766_v31 = vmax.f32 %v671_v12, 0.0  ;;  %v566_v59 = vadd.f32 %v565_v13, %v2534_v30  ;;  %v679_v32 = vadd.f32 %v678_v19, %v2539_v53 }
 0x143   :  { %v567_v21 = vpop.f32.mrf.mxu0  ;;  %v680_v28 = vpop.f32.mrf.mxu1  ;;  %v925_v34 = vadd.f32 %v924_v20, %v764_v23  ;;  %v771_v36 = vmax.f32 %v560_v15, 0.0  ;;  %v772_v58 = vmax.f32 %v562_v25, 0.0  ;;  %v1157_v38 = vsel %vm1156_vm2, %v1153_v7, %v1155_v22 }
 0x144   :  { %v568_v29 = vadd.f32 %v567_v21, %v2544_v1  ;;  %v773_v40 = vmax.f32 %v673_v27, 0.0  ;;  %v681_v63 = vadd.f32 %v680_v28, %v2549_v49  ;;  %v774_v41 = vmax.f32 %v675_v26, 0.0 }
 0x145   :  { %v569_v33 = vpop.f32.mrf.mxu0  ;;  %v682_v37 = vpop.f32.mrf.mxu1  ;;  %v1159_v9 = vsel %vm1158_vm3, %v1153_v7, %v1157_v38  ;;  %v779_v43 = vmax.f32 %v566_v59, 0.0  ;;  %v781_v44 = vmax.f32 %v679_v32, 0.0  ;;  %v951_v51 = vadd.f32 %v950_v18, %v766_v31 }
 0x146   :  { %v570_v35 = vadd.f32 %v569_v33, %v2534_v30  ;;  %v683_v39 = vadd.f32 %v682_v37, %v2539_v53  ;;  %v780_v10 = vmax.f32 %v568_v29, 0.0  ;;  %v1161_v50 = vsel %vm1160_vm4, %v1153_v7, %v1159_v9 }
 0x147   :  { %v571_v60 = vpop.f32.mrf.mxu0  ;;  %v684_v16 = vpop.f32.mrf.mxu1  ;;  %v913_v52 = vadd.f32 %v912_v24, %v771_v36  ;;  %v926_v54 = vadd.f32 %v925_v34, %v772_v58  ;;  %v939_v57 = vadd.f32 %v938_v47, %v773_v40  ;;  %v782_v61 = vmax.f32 %v681_v63, 0.0  ;;  %v2189_v63 = vld [vmem:[#allocation6 + $0x138] sm:$0xff]  }
 0x148   :  { %v572_v42 = vadd.f32 %v571_v60, %v2544_v1  ;;  %v685_v46 = vadd.f32 %v684_v16, %v2549_v49  ;;  %v787_v62 = vmax.f32 %v570_v35, 0.0  ;;  %v789_v0 = vmax.f32 %v683_v39, 0.0 }
 0x149   :  { %v575_v48 = vpop.f32.mrf.mxu0  ;;  %v688_v56 = vpop.f32.mrf.mxu1  ;;  %v927_v3 = vadd.f32 %v926_v54, %v780_v10  ;;  %v1180_v5 = vmul.f32 0.015625, %v1161_v50  ;;  %v952_v6 = vadd.f32 %v951_v51, %v774_v41  ;;  %v914_v8 = vadd.f32 %v913_v52, %v779_v43 }
 0x14a   :  { %v788_v55 = vmax.f32 %v572_v42, 0.0  ;;  %v940_v11 = vadd.f32 %v939_v57, %v781_v44  ;;  %v790_v12 = vmax.f32 %v685_v46, 0.0  ;;  %v576_v19 = vadd.f32 %v575_v48, %v2534_v30  ;;  %v2192_v42 = vld [vmem:[#allocation6 + $0x170] sm:$0xff]  }
 0x14b   :  { %v577_v2 = vpop.f32.mrf.mxu0  ;;  %v690_v4 = vpop.f32.mrf.mxu1  ;;  %v953_v23 = vadd.f32 %v952_v6, %v782_v61  ;;  %v915_v15 = vadd.f32 %v914_v8, %v787_v62  ;;  %v689_v20 = vadd.f32 %v688_v56, %v2539_v53  ;;  %v1191_v18 = vrot.slane %v1180_v5, %v2478_v45  ;;  %v2196_v8 = vld [vmem:[#allocation6 + $0x168] sm:$0xff]  }
 0x14c   :  { %v928_v14 = vadd.f32 %v927_v3, %v788_v55  ;;  %v941_v25 = vadd.f32 %v940_v11, %v789_v0  ;;  %v795_v32 = vmax.f32 %v576_v19, 0.0  ;;  %v578_v33 = vadd.f32 %v577_v2, %v2544_v1  ;;  %v2193_v0 = vld [vmem:[#allocation6 + $0x130] sm:$0xff]  }
 0x14d   :  { %v579_v13 = vpop.f32.mrf.mxu0  ;;  %v692_v7 = vpop.f32.mrf.mxu1  ;;  %v954_v21 = vadd.f32 %v953_v23, %v790_v12  ;;  %v1199_v22 = vcombine.high %v1191_v18, %v1191_v18  ;;  %v916_v31 = vrot.slane %v915_v15, 4  ;;  %v797_v36 = vmax.f32 %v689_v20, 0.0  ;;  %v2191_v20 = vld [vmem:[#allocation6 + $0x1b8] sm:$0xff]  }
 0x14e   :  { %v929_v26 = vrot.slane %v928_v14, 4  ;;  %v580_v29 = vadd.f32 %v579_v13, %v2534_v30  ;;  %v693_v28 = vadd.f32 %v692_v7, %v2539_v53  ;;  %v942_v59 = vrot.slane %v941_v25, 4 }
 0x14f   :  { %v581_v17 = vpop.f32.mrf.mxu0  ;;  %v694_v27 = vpop.f32.mrf.mxu1  ;;  %v691_v58 = vadd.f32 %v690_v4, %v2549_v49  ;;  %v1227_v37 = vpack.c.bf16 %v1199_v22, %v1199_v22  ;;  %v955_v35 = vrot.slane %v954_v21, 4  ;;  %v1226_v39 = vpack.c.bf16 %v1191_v18, %v1191_v18 }
 0x150   :  { %v582_v38 = vadd.f32 %v581_v17, %v2544_v1  ;;  %v695_v60 = vadd.f32 %v694_v27, %v2549_v49  ;;  %v1184_v41 = vcombine.high %v1180_v5, %v1180_v5  ;;  %v2609_v16 = vadd.f32 %v929_v26, %v928_v14 }
 0x151   :  { %v585_v24 = vpop.f32.mrf.mxu0  ;;  %v698_v47 = vpop.f32.mrf.mxu1  ;;  %v803_v9 = vmax.f32 %v580_v29, 0.0  ;;  %v805_v43 = vmax.f32 %v693_v28, 0.0  ;;  %1785 = vmatprep.mubr.bf16.mxu0 %v1227_v37  ;;  %v2612_v48 = vadd.f32 %v916_v31, %v915_v15  ;;  %v2614_v50 = vadd.f32 %v942_v59, %v941_v25  ;;  %v2194_v29 = vld [vmem:[#allocation6 + $0x1f0] sm:$0xff]   ;;  %v2197_v28 = vld [vmem:[#allocation6 + $0x128] sm:$0xff]  }
 0x152   :  { %v586_v44 = vadd.f32 %v585_v24, %v2534_v30  ;;  %v796_v51 = vmax.f32 %v578_v33, 0.0  ;;  %1786 = vmatmul.mubr.bf16.vlgmr.msra.gmra.mxu0 %v1226_v39  ;;  %v1198_v52 = vrot.slane %v1184_v41, %v2478_v45  ;;  %v804_v55 = vmax.f32 %v582_v38, 0.0  ;;  %v2200_v33 = vld [vmem:[#allocation6 + $0x160] sm:$0xff]   ;;  %v2195_v41 = vld [vmem:[#allocation6 + $0x1b0] sm:$0xff]  }
 0x153   :  { %v587_v34 = vpop.f32.mrf.mxu0  ;;  %v700_v40 = vpop.f32.mrf.mxu1  ;;  %v806_v56 = vmax.f32 %v695_v60, 0.0  ;;  %v699_v57 = vadd.f32 %v698_v47, %v2539_v53  ;;  %2096 = vmatpush3.bf16.msra.mxu0 %v2189_v63  ;;  %v2619_v2 = vadd.f32 %v955_v35, %v954_v21  ;;  %v798_v3 = vmax.f32 %v691_v58, 0.0 }
 0x154   :  { %v588_v61 = vadd.f32 %v587_v34, %v2544_v1  ;;  %v1200_v4 = vcombine.high %v1198_v52, %v1198_v52  ;;  %v811_v5 = vmax.f32 %v586_v44, 0.0  ;;  %2097 = vmatprep.subr.bf16.mxu0 %v2192_v42  ;;  %v931_v11 = vrot.slane %v2609_v16, 2 }
 0x155   :  { %v589_v10 = vpop.f32.mrf.mxu0  ;;  %v702_v46 = vpop.f32.mrf.mxu1  ;;  %v1013_v12 = vadd.f32 %v803_v9, %v795_v32  ;;  %v1039_v13 = vadd.f32 %v805_v43, %v797_v36  ;;  %v813_v14 = vmax.f32 %v699_v57, 0.0  ;;  %v701_v25 = vadd.f32 %v700_v40, %v2549_v49 }
 0x156   :  { %v1229_v23 = vpack.c.bf16 %v1200_v4, %v1200_v4  ;;  %v812_v15 = vmax.f32 %v588_v61, 0.0  ;;  %v590_v19 = vadd.f32 %v589_v10, %v2534_v30  ;;  %v1026_v18 = vadd.f32 %v804_v55, %v796_v51  ;;  %v2201_v51 = vld [vmem:[#allocation6 + $0x120] sm:$0xff]   ;;  %v2204_v61 = vld [vmem:[#allocation6 + $0x158] sm:$0xff]  }
 0x157   :  { %v591_v54 = vpop.f32.mrf.mxu0  ;;  %v704_v62 = vpop.f32.mrf.mxu1  ;;  %v1052_v27 = vadd.f32 %v806_v56, %v798_v3  ;;  %v1228_v21 = vpack.c.bf16 %v1198_v52, %v1198_v52  ;;  %v703_v24 = vadd.f32 %v702_v46, %v2539_v53  ;;  %2098 = vmatpush3.bf16.msra.mxu0 %v2193_v0  ;;  %v1014_v22 = vadd.f32 %v1013_v12, %v811_v5  ;;  %v2198_v46 = vld [vmem:[#allocation6 + $0x1e8] sm:$0xff]  }
 0x158   :  { %1825 = vmatprep.mubr.bf16.mxu1 %v1229_v23  ;;  %v814_v47 = vmax.f32 %v701_v25, 0.0  ;;  %v819_v31 = vmax.f32 %v590_v19, 0.0  ;;  %v592_v59 = vadd.f32 %v591_v54, %v2544_v1  ;;  %2099 = vmatprep.subr.bf16.mxu0 %v2196_v8  ;;  %v705_v36 = vadd.f32 %v704_v62, %v2549_v49 }
 0x159   :  { %v595_v6 = vpop.f32.mrf.mxu0  ;;  %v708_v7 = vpop.f32.mrf.mxu1  ;;  %1826 = vmatmul.mubr.bf16.vlgmr.msra.gmra.mxu1 %v1228_v21  ;;  %v821_v34 = vmax.f32 %v703_v24, 0.0  ;;  %v957_v40 = vrot.slane %v2619_v2, 2  ;;  %v1040_v63 = vadd.f32 %v1039_v13, %v813_v14  ;;  %v1027_v35 = vadd.f32 %v1026_v18, %v812_v15 }
 0x15a   :  { %v596_v58 = vadd.f32 %v595_v6, %v2534_v30  ;;  %v709_v37 = vadd.f32 %v708_v7, %v2539_v53  ;;  %v820_v39 = vmax.f32 %v592_v59, 0.0  ;;  %2118 = vmatpush3.bf16.msra.mxu1 %v2191_v20  ;;  %v1053_v10 = vadd.f32 %v1052_v27, %v814_v47  ;;  %v2199_v7 = vld [vmem:[#allocation6 + $0x1a8] sm:$0xff]   ;;  %v2202_v20 = vld [vmem:[#allocation6 + $0x1e0] sm:$0xff]  }
 0x15b   :  { %v597_v17 = vpop.f32.mrf.mxu0  ;;  %v710_v26 = vpop.f32.mrf.mxu1  ;;  %v1015_v42 = vadd.f32 %v1014_v22, %v819_v31  ;;  %v822_v9 = vmax.f32 %v705_v36, 0.0  ;;  %2119 = vmatprep.subr.bf16.mxu1 %v2194_v29  ;;  %2100 = vmatpush3.bf16.msra.mxu0 %v2197_v28  ;;  %v1041_v62 = vadd.f32 %v1040_v63, %v821_v34  ;;  %v2205_v29 = vld [vmem:[#allocation6 + $0x118] sm:$0xff]  }
 0x15c   :  { %v827_v43 = vmax.f32 %v596_v58, 0.0  ;;  %v829_v52 = vmax.f32 %v709_v37, 0.0  ;;  %v598_v54 = vadd.f32 %v597_v17, %v2544_v1  ;;  %v711_v55 = vadd.f32 %v710_v26, %v2549_v49  ;;  %2101 = vmatprep.subr.bf16.mxu0 %v2200_v33 }
 0x15d   :  { %v599_v32 = vpop.f32.mrf.mxu0  ;;  %v712_v38 = vpop.f32.mrf.mxu1  ;;  %v1028_v0 = vadd.f32 %v1027_v35, %v820_v39  ;;  %v1054_v18 = vadd.f32 %v1053_v10, %v822_v9  ;;  %v2206_v10 = vld [vmem:[#allocation6 + $0x1d8] sm:$0xff]  }
 0x15e   :  { %v600_v56 = vadd.f32 %v599_v32, %v2534_v30  ;;  %v1016_v3 = vadd.f32 %v1015_v42, %v827_v43  ;;  %v713_v4 = vadd.f32 %v712_v38, %v2539_v53  ;;  %v828_v6 = vmax.f32 %v598_v54, 0.0  ;;  %2120 = vmatpush3.bf16.msra.mxu1 %v2195_v41  ;;  %v2208_v32 = vld [vmem:[#allocation6 + $0x150] sm:$0xff]   ;;  %v2203_v38 = vld [vmem:[#allocation6 + $0x1a0] sm:$0xff]  }
 0x15f   :  { %v601_v60 = vpop.f32.mrf.mxu0  ;;  %v714_v44 = vpop.f32.mrf.mxu1  ;;  %v830_v8 = vmax.f32 %v711_v55, 0.0  ;;  %2121 = vmatprep.subr.bf16.mxu1 %v2198_v46  ;;  %2102 = vmatpush3.bf16.msra.mxu0 %v2201_v51  ;;  %v1042_v27 = vadd.f32 %v1041_v62, %v829_v52  ;;  %v2209_v46 = vld [vmem:[#allocation6 + $0x110] sm:$0xff]   ;;  %v2212_v55 = vld [vmem:[#allocation6 + $0x148] sm:$0xff]   ;;  %v2207_v62 = vld [vmem:[#allocation6 + $0x198] sm:$0xff]  }
 0x160   :  { %v835_v12 = vmax.f32 %v600_v56, 0.0  ;;  %v602_v13 = vadd.f32 %v601_v60, %v2544_v1  ;;  %v837_v23 = vmax.f32 %v713_v4, 0.0  ;;  %v715_v15 = vadd.f32 %v714_v44, %v2549_v49  ;;  %2103 = vmatprep.subr.bf16.mxu0 %v2204_v61 }
 0x161   :  { %v605_v57 = vpop.f32.mrf.mxu0  ;;  %v718_v5 = vpop.f32.mrf.mxu1  ;;  %v1029_v21 = vadd.f32 %v1028_v0, %v828_v6  ;;  %v1055_v33 = vadd.f32 %v1054_v18, %v830_v8  ;;  %v918_v56 = vrot.slane %v2612_v48, 2  ;;  %v944_v0 = vrot.slane %v2614_v50, 2 }
 0x162   :  { %v606_v25 = vadd.f32 %v605_v57, %v2534_v30  ;;  %v719_v19 = vadd.f32 %v718_v5, %v2539_v53  ;;  %v836_v24 = vmax.f32 %v602_v13, 0.0  ;;  %v1017_v28 = vadd.f32 %v1016_v3, %v835_v12  ;;  %2122 = vmatpush3.bf16.msra.mxu1 %v2199_v7  ;;  %v2210_v5 = vld [vmem:[#allocation6 + $0x1d0] sm:$0xff]  }
 0x163   :  { %v607_v14 = vpop.f32.mrf.mxu0  ;;  %v720_v17 = vpop.f32.mrf.mxu1  ;;  %v838_v22 = vmax.f32 %v715_v15, 0.0  ;;  %v1043_v63 = vadd.f32 %v1042_v27, %v837_v23  ;;  %2123 = vmatprep.subr.bf16.mxu1 %v2202_v20  ;;  %2104 = vmatpush3.bf16.msra.mxu0 %v2205_v29  ;;  %v932_v12 = vadd.f32 %v931_v11, %v2609_v16  ;;  %v958_v13 = vadd.f32 %v957_v40, %v2619_v2  ;;  %v2216_v23 = vld [vmem:[#allocation6 + $0x140] sm:$0xff]   ;;  %v2214_v16 = vld [vmem:[#allocation6 + $0x1c8] sm:$0xff]  }
 0x164   :  { %v843_v47 = vmax.f32 %v606_v25, 0.0  ;;  %v845_v31 = vmax.f32 %v719_v19, 0.0  ;;  %v608_v34 = vadd.f32 %v607_v14, %v2544_v1  ;;  %v721_v36 = vadd.f32 %v720_v17, %v2549_v49  ;;  %2105 = vmatprep.subr.bf16.mxu0 %v2208_v32  ;;  %v2211_v19 = vld [vmem:[#allocation6 + $0x190] sm:$0xff]   ;;  %v2217_v2 = vld [vmem:[#allocation6 + $0x100] sm:$0xff]  }
 0x165   :  { %v609_v26 = vpop.f32.mrf.mxu0  ;;  %v722_v59 = vpop.f32.mrf.mxu1  ;;  %v1030_v35 = vadd.f32 %v1029_v21, %v836_v24  ;;  %v1056_v51 = vadd.f32 %v1055_v33, %v838_v22  ;;  %v919_v17 = vadd.f32 %v918_v56, %v2612_v48  ;;  %v945_v20 = vadd.f32 %v944_v0, %v2614_v50  ;;  %v2218_v32 = vld [vmem:[#allocation6 + $0x1c0] sm:$0xff]  }
 0x166   :  { %v610_v58 = vadd.f32 %v609_v26, %v2534_v30  ;;  %v1018_v39 = vadd.f32 %v1017_v28, %v843_v47  ;;  %v723_v60 = vadd.f32 %v722_v59, %v2539_v53  ;;  %v844_v42 = vmax.f32 %v608_v34, 0.0  ;;  %2124 = vmatpush3.bf16.msra.mxu1 %v2203_v38  ;;  %v2215_v47 = vld [vmem:[#allocation6 + $0x188] sm:$0xff]  }
 0x167   :  { %v611_v37 = vpop.f32.mrf.mxu0  ;;  %v724_v41 = vpop.f32.mrf.mxu1  ;;  %v846_v9 = vmax.f32 %v721_v36, 0.0  ;;  %v1044_v30 = vadd.f32 %v1043_v63, %v845_v31  ;;  %2125 = vmatprep.subr.bf16.mxu1 %v2206_v10  ;;  %2106 = vmatpush3.bf16.msra.mxu0 %v2209_v46  ;;  %v933_v40 = vrot.slane %v932_v12, 1  ;;  %v959_v24 = vrot.slane %v958_v13, 1 }
 0x168   :  { %v851_v43 = vmax.f32 %v610_v58, 0.0  ;;  %v612_v44 = vadd.f32 %v611_v37, %v2544_v1  ;;  %v853_v52 = vmax.f32 %v723_v60, 0.0  ;;  %v725_v54 = vadd.f32 %v724_v41, %v2549_v49  ;;  %v2213_v49 = vld [vmem:[#allocation6 + $0x108] sm:$0xff]   ;;  %2107 = vmatprep.subr.bf16.mxu0 %v2212_v55 }
 0x169   :  { %v1031_v53 = vadd.f32 %v1030_v35, %v844_v42  ;;  %v1057_v3 = vadd.f32 %v1056_v51, %v846_v9  ;;  %v920_v48 = vrot.slane %v919_v17, 1  ;;  %v946_v31 = vrot.slane %v945_v20, 1  ;;  %v2219_v35 = vld [vmem:[#allocation6 + $0x180] sm:$0xff]  }
 0x16a   :  { %v1019_v57 = vadd.f32 %v1018_v39, %v851_v43  ;;  %v852_v61 = vmax.f32 %v612_v44, 0.0  ;;  %v1045_v1 = vadd.f32 %v1044_v30, %v853_v52  ;;  %v854_v4 = vmax.f32 %v725_v54, 0.0  ;;  %2126 = vmatpush3.bf16.msra.mxu1 %v2207_v62 }
 0x16b   :  { %2127 = vmatprep.subr.bf16.mxu1 %v2210_v5  ;;  %2108 = vmatpush3.bf16.msra.mxu0 %v2213_v49  ;;  %v934_v36 = vadd.f32 %v933_v40, %v932_v12  ;;  %v960_v58 = vadd.f32 %v959_v24, %v958_v13  ;;  %v921_v39 = vadd.f32 %v920_v48, %v919_v17 }
 0x16c   :  { %v1020_v6 = vrot.slane %v1019_v57, 4  ;;  %v1032_v8 = vadd.f32 %v1031_v53, %v852_v61  ;;  %v1046_v14 = vrot.slane %v1045_v1, 4  ;;  %v1058_v7 = vadd.f32 %v1057_v3, %v854_v4  ;;  %2109 = vmatprep.subr.bf16.mxu0 %v2216_v23 }
 0x16d   :  { %v947_v60 = vadd.f32 %v946_v31, %v945_v20  ;;  %v1098_v9 = vcombine.low %v921_v39, %v934_v36 }
 0x16e   :  { %v1021_v15 = vadd.f32 %v1020_v6, %v1019_v57  ;;  %v1033_v25 = vrot.slane %v1032_v8, 4  ;;  %v1047_v18 = vadd.f32 %v1046_v14, %v1045_v1  ;;  %v1059_v27 = vrot.slane %v1058_v7, 4  ;;  %2128 = vmatpush3.bf16.msra.mxu1 %v2211_v19 }
 0x16f   :  { %2129 = vmatprep.subr.bf16.mxu1 %v2214_v16  ;;  %2110 = vmatpush3.bf16.msra.mxu0 %v2217_v2  ;;  %v1099_v43 = vcombine.low %v947_v60, %v960_v58  ;;  %v1106_v54 = vrot.slane %v1098_v9, %v2478_v45 }
 0x170   :  { %v1022_v11 = vrot.slane %v1021_v15, 2  ;;  %v1034_v21 = vadd.f32 %v1033_v25, %v1032_v8  ;;  %v1048_v26 = vrot.slane %v1047_v18, 2  ;;  %v1060_v29 = vadd.f32 %v1059_v27, %v1058_v7 }
 0x171   :  { %v1113_v55 = vrot.slane %v1099_v43, %v2478_v45 }
 0x172   :  { %v1023_v28 = vadd.f32 %v1022_v11, %v1021_v15  ;;  %v1035_v22 = vrot.slane %v1034_v21, 2  ;;  %v1049_v50 = vadd.f32 %v1048_v26, %v1047_v18  ;;  %v1061_v59 = vrot.slane %v1060_v29, 2  ;;  %2130 = vmatpush3.bf16.msra.mxu1 %v2215_v47 }
 0x173   :  { %2131 = vmatprep.subr.bf16.mxu1 %v2218_v32  ;;  %v1114_v57 = vcombine.low %v1106_v54, %v1113_v55 }
 0x174   :  { %v1024_v33 = vrot.slane %v1023_v28, 1  ;;  %v1036_v34 = vadd.f32 %v1035_v22, %v1034_v21  ;;  %v1050_v37 = vrot.slane %v1049_v50, 1  ;;  %v1062_v38 = vadd.f32 %v1061_v59, %v1060_v29 }
 0x176   :  { %v1037_v63 = vrot.slane %v1036_v34, 1  ;;  %v1063_v41 = vrot.slane %v1062_v38, 1  ;;  %v1025_v10 = vadd.f32 %v1024_v33, %v1023_v28  ;;  %v1051_v44 = vadd.f32 %v1050_v37, %v1049_v50  ;;  %2132 = vmatpush3.bf16.msra.mxu1 %v2219_v35 }
 0x178   :  { %v1038_v42 = vadd.f32 %v1037_v63, %v1036_v34  ;;  %v1064_v46 = vadd.f32 %v1063_v41, %v1062_v38 }
 0x17a   :  { %v1132_v51 = vcombine.low %v1025_v10, %v1038_v42  ;;  %v1133_v30 = vcombine.low %v1051_v44, %v1064_v46 }
 0x17c   :  { %v1140_v52 = vrot.slane %v1132_v51, %v2478_v45  ;;  %v1147_v56 = vrot.slane %v1133_v30, %v2478_v45 }
 0x17e   :  { %v1148_v53 = vcombine.low %v1140_v52, %v1147_v56 }
 0x180   :  { %v1164_v61 = vrot.slane %v1148_v53, 7 }
 0x182   :  { %v1165_v62 = vsel %vm1154_vm1, %v1164_v61, %v1114_v57 }
 0x183   :  { %v1166_v0 = vsel %vm1156_vm2, %v1164_v61, %v1165_v62 }
 0x184   :  { %v1167_v3 = vsel %vm1158_vm3, %v1164_v61, %v1166_v0 }
 0x185   :  { %v1168_v1 = vsel %vm1160_vm4, %v1164_v61, %v1167_v3 }
 0x186   :  { %v1181_v4 = vmul.f32 0.015625, %v1168_v1 }
 0x188   :  { %v1208_v5 = vrot.slane %v1181_v4, %v2478_v45  ;;  %v1201_v6 = vcombine.high %v1181_v4, %v1181_v4 }
 0x18a   :  { %v1216_v8 = vcombine.high %v1208_v5, %v1208_v5  ;;  %v1215_v49 = vrot.slane %v1201_v6, %v2478_v45  ;;  %v1230_v14 = vpack.c.bf16 %v1208_v5, %v1208_v5  ;;  %v1986_v45 = vld [vmem:[%s2674_s4] ss:$0 sm:$0xff]  ;;  %s2260_s4 = scalar_lea.vmem %s1921_s24, 32 }
 0x18b   :  { %p2261_p10 = scmp.ne.s32.totalorder %s1921_s24, %s2260_s4  ;;  %p2266_p12 = scmp.lt.s32.totalorder %s2260_s4, %s2260_s4 }
 0x18c   :  { %v1231_v12 = vpack.c.bf16 %v1216_v8, %v1216_v8  ;;  %v1217_v13 = vcombine.high %v1215_v49, %v1215_v49  ;;  %v1232_v23 = vpack.c.bf16 %v1215_v49, %v1215_v49 }
 0x18d   :  { %p2267_p13 = por %p2266_p12, %p2265_p11 }
 0x18e   :  { %1865 = vmatprep.mubr.bf16.mxu0 %v1231_v12  ;;  %v1233_v7 = vpack.c.bf16 %v1217_v13, %v1217_v13 }
 0x18f   :  { %1866 = vmatmul.mubr.bf16.vlgmr.msra.gmra.mxu0 %v1230_v14  ;;  %p2268_p0 = pnand %p2267_p13, %p2261_p10 }
 0x190   :  { %1905 = vmatprep.mubr.bf16.mxu1 %v1233_v7 }
 0x191   :  { %1906 = vmatmul.mubr.bf16.vlgmr.msra.gmra.mxu1 %v1232_v23 }
 0x212   :  { %v2067_v15 = vpop.f32.mrf.mxu0 }
 0x214   :  { %v2068_v25 = vpop.f32.mrf.mxu0 }
 0x215   :  { %v2069_v11 = vadd.f32 %v2068_v25, %v2067_v15 }
 0x216   :  { %v2070_v19 = vpop.f32.mrf.mxu0 }
 0x217   :  { %v1788_v21 = vadd.f32 %v2069_v11, %v1986_v45 }
 0x218   :  { %v2071_v17 = vpop.f32.mrf.mxu0 }
 0x219   :  { %v2089_v20 = vpop.f32.mrf.mxu1 }
 0x21b   :  { %v2090_v18 = vpop.f32.mrf.mxu1 }
 0x21c   :  { %v2091_v2 = vadd.f32 %v2090_v18, %v2089_v20 }
 0x21d   :  { %v2092_v27 = vpop.f32.mrf.mxu1 }
 0x21e   :  { %v1828_v29 = vadd.f32 %v2091_v2, %v1788_v21 }
 0x21f   :  { %v2093_v16 = vpop.f32.mrf.mxu1 }
 0x24f   :  { %v2111_v40 = vpop.f32.mrf.mxu0 }
 0x251   :  { %v2112_v24 = vpop.f32.mrf.mxu0  ;;  %v2133_v26 = vpop.f32.mrf.mxu1 }
 0x252   :  { %v2113_v28 = vadd.f32 %v2112_v24, %v2111_v40 }
 0x253   :  { %v2114_v22 = vpop.f32.mrf.mxu0  ;;  %v2134_v47 = vpop.f32.mrf.mxu1 }
 0x254   :  { %v1868_v48 = vadd.f32 %v2113_v28, %v1828_v29  ;;  %v2135_v31 = vadd.f32 %v2134_v47, %v2133_v26 }
 0x255   :  { %v2115_v50 = vpop.f32.mrf.mxu0  ;;  %v2136_v59 = vpop.f32.mrf.mxu1 }
 0x256   :  { %v1908_v32 = vadd.f32 %v2135_v31, %v1868_v48 }
 0x257   :  { %v2137_v33 = vpop.f32.mrf.mxu1 }
 0x258   :  { %1913 = vst [vmem:[#allocation8] sm:$0x3] %v1908_v32 }
 0x259   :  { %2271 = shalt.err (!%p2268_p0)
}
 0x25a   :  { %1923 = dma.vmem_to_hbm [thread:$0]  %s1921_s24, 32, %s2675_s5, [#allocation5]  }
 0x25b   :  { %2284 = dma.done.wait [#allocation5], 32  }
 0x25c   :  { %2285 = vsyncadd [#allocation5], 4294967264 }
 0x25d   :  { %1927 = vsyncpa [#allocation4], 1 }
 0x25e   :  { %1928 = vsyncpa [#allocation7], 1 }
 0x25f   :  { %1929 = vsyncpa [#allocation5], 1 }

</bundles_post_ra>
